<compile_context>
chip_gen: v7x
topology: tpu7x:2x2x1
jax: 0.10.0
libtpu: 0.0.40
codegen_flags: <defaults>
</compile_context>

<pallas_src>
import functools
from typing import NamedTuple

import jax
import jax.numpy as jnp
from jax.experimental import pallas as pl
from jax.experimental.pallas import tpu as pltpu


def _round_up(x: int, m: int) -> int:
    return ((x + m - 1) // m) * m


# --------------------------------------------------------------------------
# Kernels
# --------------------------------------------------------------------------

def _mlp_resident_kernel(x_ref, w1t_ref, b1_ref, w2t_ref, b2_ref, o_ref):
    """Fused Linear -> ReLU -> Linear, weights fully VMEM-resident.

    x_ref  : [TB, Din_p]    input dtype (cast to weight dtype in-kernel)
    w1t_ref: [Din_p, Dh_p]  bf16, resident across the whole grid
    b1_ref : [1, Dh_p]      f32
    w2t_ref: [Dh_p, Dout_p] bf16, resident
    b2_ref : [1, Dout_p]    f32
    o_ref  : [TB, Dout_p]   out dtype
    """
    xb = x_ref[...].astype(w1t_ref.dtype)          # VPU cast, hides under MXU
    h = jnp.dot(xb, w1t_ref[...], preferred_element_type=jnp.float32)
    h = jnp.maximum(h + b1_ref[...], 0.0)          # f32 bias + ReLU on VPU
    y = jnp.dot(h.astype(w2t_ref.dtype), w2t_ref[...],
                preferred_element_type=jnp.float32)
    o_ref[...] = (y + b2_ref[...]).astype(o_ref.dtype)


def _mlp_ksplit_kernel(x_ref, w1t_ref, b1_ref, w2t_ref, b2_ref, o_ref, acc_ref):
    """Same MLP with the hidden dim split over grid axis 1 (contraction).

    Per hidden chunk k: h_k = relu(x @ w1t[:, k] + b1[k]); acc += h_k @ w2t[k].
    acc_ref is a f32 VMEM accumulator initialized at k==0 and stored at the
    last k (bias b2 added once at finalize).
    """
    k = pl.program_id(1)

    @pl.when(k == 0)
    def _():
        acc_ref[...] = jnp.zeros_like(acc_ref)

    xb = x_ref[...].astype(w1t_ref.dtype)
    h = jnp.dot(xb, w1t_ref[...], preferred_element_type=jnp.float32)
    h = jnp.maximum(h + b1_ref[...], 0.0)
    acc_ref[...] += jnp.dot(h.astype(w2t_ref.dtype), w2t_ref[...],
                            preferred_element_type=jnp.float32)

    @pl.when(k == pl.num_programs(1) - 1)
    def _():
        o_ref[...] = (acc_ref[...] + b2_ref[...]).astype(o_ref.dtype)


# --------------------------------------------------------------------------
# One-time parameter preparation (outside the hot forward path)
# --------------------------------------------------------------------------

def prepare_params(w1, b1, w2, b2, compute_dtype=jnp.bfloat16):
    """Pre-transpose / cast / lane-pad PyTorch-convention Linear weights.

    w1: [hid, in], b1: [hid], w2: [out, hid], b2: [out]
    """
    d_hid, d_in = w1.shape
    d_out = w2.shape[0]
    # NOTE: on v6e/v7x one may pad to 256 multiples (2x256x256 MXU) when the
    # extra FLOPs are <~25%; we keep 128 padding to avoid waste at small dims.
    din_p = _round_up(d_in, 128)
    dh_p = _round_up(d_hid, 128)
    dout_p = _round_up(d_out, 128)

    w1t = jnp.asarray(w1, compute_dtype).T                       # [in, hid]
    w1t = jnp.pad(w1t, ((0, din_p - d_in), (0, dh_p - d_hid)))
    w2t = jnp.asarray(w2, compute_dtype).T                       # [hid, out]
    w2t = jnp.pad(w2t, ((0, dh_p - d_hid), (0, dout_p - d_out)))
    b1r = jnp.pad(jnp.asarray(b1, jnp.float32).reshape(1, -1),
                  ((0, 0), (0, dh_p - d_hid)))
    b2r = jnp.pad(jnp.asarray(b2, jnp.float32).reshape(1, -1),
                  ((0, 0), (0, dout_p - d_out)))
    return (w1t, b1r, w2t, b2r, d_in, d_out)


# --------------------------------------------------------------------------
# Planning (all static config decided outside jit)
# --------------------------------------------------------------------------

class _Plan(NamedTuple):
    tb: int                      # batch tile rows (multiple of 8)
    tk: int                      # hidden chunk (== dh_p when resident)
    n_k: int                     # hidden grid steps (1 => resident weights)
    vmem_limit: int              # compiler vmem_limit_bytes
    out_dtype: str               # output dtype name
    single_buffer_weights: bool  # pin constant blocks with Buffered(1)


def _device_budget():
    """(usable VMEM budget bytes, tensorcores per chip)."""
    vmem_phys = 64 * 1024 * 1024     # conservative fallback (v7x per-TC)
    num_cores = 1
    try:
        info = pltpu.get_tpu_info()
        for attr in ("vmem_capacity_bytes", "vmem_bytes", "vmem_capacity"):
            v = getattr(info, attr, None)
            if v:
                vmem_phys = int(v)
                break
        for attr in ("num_cores", "tensorcore_count", "num_tensorcores",
                     "cores_per_chip"):
            v = getattr(info, attr, None)
            if v:
                num_cores = int(v)
                break
    except Exception:
        pass
    return int(0.85 * vmem_phys), num_cores


def _plan(B, x_itemsize, din_p, dh_p, dout_p, w_itemsize, out_dtype,
          vmem_budget_bytes=None, single_buffer_ok=True):
    budget, num_cores = _device_budget()
    if vmem_budget_bytes is not None:
        budget = int(vmem_budget_bytes)
    out_itemsize = jnp.dtype(out_dtype).itemsize

    resident_weight_bytes = ((din_p * dh_p + dh_p * dout_p) * w_itemsize
                             + (dh_p + dout_p) * 4)

    if resident_weight_bytes <= budget // 2:
        tk, n_k = dh_p, 1
        weight_vmem = resident_weight_bytes      # single-buffered (Buffered(1))
    else:
        # Contraction split over the hidden dim (formerly a TODO): pick the
        # largest tk (multiple of 128, dividing dh_p) whose double-buffered
        # weight chunks fit ~half the budget.
        m = dh_p // 128
        tk = 128
        for d in range(m, 0, -1):
            if m % d:
                continue
            cand = 128 * d
            chunk = 2 * ((din_p + dout_p) * cand * w_itemsize + cand * 4) + dout_p * 4
            if chunk <= budget // 2:
                tk = cand
                break
        n_k = dh_p // tk
        weight_vmem = 2 * ((din_p + dout_p) * tk * w_itemsize + tk * 4) + dout_p * 4

    # Largest batch tile that fits: 2x x-tile + 2x out-tile + f32 h + bf16 h
    # copy (+ f32 accumulator for the K-split path).
    b8 = _round_up(max(B, 1), 8)
    tb = min(8, b8)
    for cand in (512, 256, 128, 64, 32, 16, 8):
        cand = min(cand, b8)
        tile_vmem = (2 * cand * din_p * x_itemsize
                     + 2 * cand * dout_p * out_itemsize
                     + cand * tk * 4
                     + cand * tk * w_itemsize
                     + (cand * dout_p * 4 if n_k > 1 else 0))
        if weight_vmem + tile_vmem <= budget:
            tb = cand
            break

    # Megacore (v7x): keep the parallel batch axis a multiple of the core
    # count so neither TensorCore idles.
    bp = _round_up(B, tb)
    n_tiles = bp // tb
    if num_cores > 1 and n_tiles % num_cores != 0 and b8 >= 8 * num_cores:
        desired = _round_up(n_tiles, num_cores)
        tb2 = _round_up(-(-B // desired), 8)
        if tb2 >= 8:
            bp2 = _round_up(B, tb2)
            if (bp2 // tb2) % num_cores == 0:
                tb = tb2

    vmem_limit = max(16 * 1024 * 1024, budget)

    return _Plan(tb=tb, tk=tk, n_k=n_k, vmem_limit=vmem_limit,
                 out_dtype=jnp.dtype(out_dtype).name,
                 single_buffer_weights=bool(single_buffer_ok))


# --------------------------------------------------------------------------
# Forward
# --------------------------------------------------------------------------

def _spec(shape, index_map, mode):
    if mode is None:
        return pl.BlockSpec(shape, index_map)
    return pl.BlockSpec(shape, index_map, pipeline_mode=mode)


@functools.partial(jax.jit, static_argnums=(5, 6, 7))
def _forward_impl(x, w1t, b1r, w2t, b2r, d_in, d_out, plan):
    B = x.shape[0]
    din_p, dh_p = w1t.shape
    dout_p = w2t.shape[1]
    out_dtype = jnp.dtype(plan.out_dtype)
    w_itemsize = jnp.dtype(w1t.dtype).itemsize
    tb, tk, n_k = plan.tb, plan.tk, plan.n_k

    bp = _round_up(B, tb)
    n_tiles = bp // tb

    # Only touch x in the wrapper when padding is actually required; the
    # bf16 cast happens inside the kernel (no extra HBM pass).
    xp = x
    if bp != B or din_p != d_in:
        xp = jnp.pad(x, ((0, bp - B), (0, din_p - d_in)))

    weight_bytes = (din_p * dh_p + dh_p * dout_p) * w_itemsize + (dh_p + dout_p) * 4
    cost = pl.CostEstimate(
        flops=2 * bp * (din_p * dh_p + dh_p * dout_p),
        transcendentals=0,
        bytes_accessed=int(xp.size * jnp.dtype(xp.dtype).itemsize
                           + weight_bytes * (1 if n_k == 1 else n_tiles)
                           + bp * dout_p * out_dtype.itemsize),
    )

    if n_k == 1:
        # Weights fully VMEM-resident; constant blocks single-buffered.
        wmode = pl.Buffered(1) if plan.single_buffer_weights else None
        grid = (n_tiles,)
        in_specs = [
            pl.BlockSpec((tb, din_p), lambda i: (i, 0)),            # x tile
            _spec((din_p, dh_p), lambda i: (0, 0), wmode),          # w1t
            _spec((1, dh_p), lambda i: (0, 0), wmode),               # b1
            _spec((dh_p, dout_p), lambda i: (0, 0), wmode),          # w2t
            _spec((1, dout_p), lambda i: (0, 0), wmode),             # b2
        ]
        out_specs = pl.BlockSpec((tb, dout_p), lambda i: (i, 0))
        scratch = ()
        kernel = _mlp_resident_kernel
        dims = ("parallel",)
    else:
        # Hidden-dim contraction split: weight chunks stream (double-buffered),
        # f32 accumulator in VMEM, b2 single-buffered (constant).
        b2mode = pl.Buffered(1) if plan.single_buffer_weights else None
        grid = (n_tiles, n_k)
        in_specs = [
            pl.BlockSpec((tb, din_p), lambda i, k: (i, 0)),          # x tile
            pl.BlockSpec((din_p, tk), lambda i, k: (0, k)),          # w1t chunk
            pl.BlockSpec((1, tk), lambda i, k: (0, k)),              # b1 chunk
            pl.BlockSpec((tk, dout_p), lambda i, k: (k, 0)),         # w2t chunk
            _spec((1, dout_p), lambda i, k: (0, 0), b2mode),         # b2
        ]
        out_specs = pl.BlockSpec((tb, dout_p), lambda i, k: (i, 0))
        scratch = (pltpu.VMEM((tb, dout_p), jnp.float32),)
        kernel = _mlp_ksplit_kernel
        dims = ("parallel", "arbitrary")

    out_p = pl.pallas_call(
        kernel,
        out_shape=jax.ShapeDtypeStruct((bp, dout_p), out_dtype),
        grid_spec=pltpu.PrefetchScalarGridSpec(
            num_scalar_prefetch=0,
            grid=grid,
            in_specs=in_specs,
            out_specs=out_specs,
            scratch_shapes=scratch,
        ),
        compiler_params=pltpu.CompilerParams(
            dimension_semantics=dims,
            vmem_limit_bytes=plan.vmem_limit,
        ),
        cost_estimate=cost,
    )(xp, w1t, b1r, w2t, b2r)

    return out_p[:B, :d_out]


_BUFFERED_ONE_SUPPORTED = True   # flipped off once if this build rejects Buffered(1)


def naive_ddp_forward(x, params, out_dtype=jnp.float32, vmem_budget_bytes=None):
    """Forward of NaiveDDP(module) where module = Linear -> ReLU -> Linear.

    x      : [B, d_in] (any float dtype)
    params : output of prepare_params() (pre-transposed / padded / bf16)
    returns: [B, d_out] in out_dtype (f32 default; pass bf16 to halve output
             HBM traffic)
    """
    global _BUFFERED_ONE_SUPPORTED
    w1t, b1r, w2t, b2r, d_in, d_out = params
    din_p, dh_p = w1t.shape
    dout_p = w2t.shape[1]

    plan = _plan(x.shape[0], jnp.dtype(x.dtype).itemsize, din_p, dh_p, dout_p,
                 jnp.dtype(w1t.dtype).itemsize, out_dtype,
                 vmem_budget_bytes, _BUFFERED_ONE_SUPPORTED)
    try:
        return _forward_impl(x, w1t, b1r, w2t, b2r, d_in, d_out, plan)
    except Exception:
        if not plan.single_buffer_weights:
            raise
        # This JAX build does not accept Buffered(1); fall back to default
        # double-buffering (same kernel, slightly more VMEM) and remember.
        _BUFFERED_ONE_SUPPORTED = False
        plan = plan._replace(single_buffer_weights=False)
        return _forward_impl(x, w1t, b1r, w2t, b2r, d_in, d_out, plan)


# --------------------------------------------------------------------------
# Reference (mirrors the kernel's bf16-operand / f32-accumulate precision)
# --------------------------------------------------------------------------

def _reference(x, w1, b1, w2, b2, compute_dtype=jnp.bfloat16):
    xb = x.astype(compute_dtype)
    w1b = jnp.asarray(w1, compute_dtype)
    w2b = jnp.asarray(w2, compute_dtype)
    h = jnp.dot(xb, w1b.T, preferred_element_type=jnp.float32) + b1
    h = jnp.maximum(h, 0.0)
    y = jnp.dot(h.astype(compute_dtype), w2b.T,
                preferred_element_type=jnp.float32) + b2
    return y


if __name__ == "__main__":
    key = jax.random.PRNGKey(0)

    def make_case(key, B, D_in, D_hid, D_out):
        k_x, k_w1, k_b1, k_w2, k_b2 = jax.random.split(key, 5)
        x = jax.random.normal(k_x, (B, D_in), dtype=jnp.float32)
        w1 = jax.random.normal(k_w1, (D_hid, D_in), dtype=jnp.float32) * 0.1
        b1 = jax.random.normal(k_b1, (D_hid,), dtype=jnp.float32) * 0.1
        w2 = jax.random.normal(k_w2, (D_out, D_hid), dtype=jnp.float32) * 0.1
        b2 = jax.random.normal(k_b2, (D_out,), dtype=jnp.float32) * 0.1
        return x, w1, b1, w2, b2

    ok = True
    k1, k2, k3 = jax.random.split(key, 3)

    # Case 1: lane-aligned shapes, VMEM-resident weight path (no wrapper pad).
    x, w1, b1, w2, b2 = make_case(k1, B=256, D_in=128, D_hid=256, D_out=128)
    params = prepare_params(w1, b1, w2, b2)          # one-time prep, not per call
    y = jax.block_until_ready(naive_ddp_forward(x, params))
    y_ref = _reference(x, w1, b1, w2, b2)
    ok &= y.shape == (256, 128)
    ok &= bool(jnp.allclose(y, y_ref, atol=2e-2, rtol=2e-2))

    # Case 2: unaligned small shapes exercise the padding path.
    x, w1, b1, w2, b2 = make_case(k2, B=10, D_in=48, D_hid=72, D_out=40)
    params = prepare_params(w1, b1, w2, b2)
    y = jax.block_until_ready(naive_ddp_forward(x, params))
    y_ref = _reference(x, w1, b1, w2, b2)
    ok &= y.shape == (10, 40)
    ok &= bool(jnp.allclose(y, y_ref, atol=2e-2, rtol=2e-2))

    # Case 3: tiny VMEM budget forces the hidden-dim contraction split
    # (accumulator + pl.when init/finalize) -- the path large models take on v7x.
    x, w1, b1, w2, b2 = make_case(k3, B=16, D_in=128, D_hid=512, D_out=128)
    params = prepare_params(w1, b1, w2, b2)
    y = jax.block_until_ready(
        naive_ddp_forward(x, params, vmem_budget_bytes=400 * 1024))
    y_ref = _reference(x, w1, b1, w2, b2)
    ok &= y.shape == (16, 128)
    ok &= bool(jnp.allclose(y, y_ref, atol=3e-2, rtol=3e-2))

    assert ok, "mismatch vs reference"
    print("KERNEL_OK")
</pallas_src>

<mosaic_0001>
module attributes {stable_mosaic.version = 11 : i64} {
  func.func @_mlp_resident_kernel(%arg0: i32, %arg1: memref<256x128xf32, #tpu.memory_space<vmem>>, %arg2: memref<128x256xbf16, #tpu.memory_space<vmem>>, %arg3: memref<1x256xf32, #tpu.memory_space<vmem>>, %arg4: memref<256x128xbf16, #tpu.memory_space<vmem>>, %arg5: memref<1x128xf32, #tpu.memory_space<vmem>>, %arg6: memref<256x128xf32, #tpu.memory_space<vmem>>) attributes {dimension_semantics = [#tpu.dimension_semantics<parallel>], iteration_bounds = array<i64: 1>, scalar_prefetch = 0 : i64, scratch_operands = 0 : i64, tpu.core_type = #tpu.core_type<tc>, window_params = [{transform_indices = @transform_0, window_bounds = array<i64: 256, 128>}, {pipeline_mode = #tpu.pipeline_mode<synchronous>, transform_indices = @transform_1, window_bounds = array<i64: 128, 256>}, {pipeline_mode = #tpu.pipeline_mode<synchronous>, transform_indices = @transform_2, window_bounds = array<i64: 1, 256>}, {pipeline_mode = #tpu.pipeline_mode<synchronous>, transform_indices = @transform_3, window_bounds = array<i64: 256, 128>}, {pipeline_mode = #tpu.pipeline_mode<synchronous>, transform_indices = @transform_4, window_bounds = array<i64: 1, 128>}, {transform_indices = @transform_5, window_bounds = array<i64: 256, 128>}]} {
    %c0 = arith.constant 0 : index
    %c0_0 = arith.constant 0 : index
    %0 = vector.load %arg1[%c0, %c0_0] : memref<256x128xf32, #tpu.memory_space<vmem>>, vector<256x128xf32>
    %1 = arith.truncf %0 : vector<256x128xf32> to vector<256x128xbf16>
    %c0_1 = arith.constant 0 : index
    %c0_2 = arith.constant 0 : index
    %2 = vector.load %arg2[%c0_1, %c0_2] : memref<128x256xbf16, #tpu.memory_space<vmem>>, vector<128x256xbf16>
    %cst = arith.constant dense<0.000000e+00> : vector<256x256xf32>
    %3 = tpu.matmul %1, %2, %cst {dimension_numbers = #tpu.dot_dimension_numbers<[1], [0], [0], [1], [0, 0, 1, 1], [], []>} : vector<256x128xbf16>, vector<128x256xbf16>, vector<256x256xf32> -> vector<256x256xf32>
    %c0_3 = arith.constant 0 : index
    %c0_4 = arith.constant 0 : index
    %4 = vector.load %arg3[%c0_3, %c0_4] : memref<1x256xf32, #tpu.memory_space<vmem>>, vector<1x256xf32>
    %5 = vector.broadcast %4 : vector<1x256xf32> to vector<256x256xf32>
    %6 = arith.addf %3, %5 : vector<256x256xf32>
    %cst_5 = arith.constant 0.000000e+00 : f32
    %7 = vector.broadcast %cst_5 : f32 to vector<256x256xf32>
    %8 = arith.maximumf %6, %7 : vector<256x256xf32>
    %9 = arith.truncf %8 : vector<256x256xf32> to vector<256x256xbf16>
    %c0_6 = arith.constant 0 : index
    %c0_7 = arith.constant 0 : index
    %10 = vector.load %arg4[%c0_6, %c0_7] : memref<256x128xbf16, #tpu.memory_space<vmem>>, vector<256x128xbf16>
    %cst_8 = arith.constant dense<0.000000e+00> : vector<256x128xf32>
    %11 = tpu.matmul %9, %10, %cst_8 {dimension_numbers = #tpu.dot_dimension_numbers<[1], [0], [0], [1], [0, 0, 1, 1], [], []>} : vector<256x256xbf16>, vector<256x128xbf16>, vector<256x128xf32> -> vector<256x128xf32>
    %c0_9 = arith.constant 0 : index
    %c0_10 = arith.constant 0 : index
    %12 = vector.load %arg5[%c0_9, %c0_10] : memref<1x128xf32, #tpu.memory_space<vmem>>, vector<1x128xf32>
    %13 = vector.broadcast %12 : vector<1x128xf32> to vector<256x128xf32>
    %14 = arith.addf %11, %13 : vector<256x128xf32>
    %c0_11 = arith.constant 0 : index
    %c0_12 = arith.constant 0 : index
    %15 = vector.load %arg6[%c0_11, %c0_12] : memref<256x128xf32, #tpu.memory_space<vmem>>, vector<256x128xf32>
    tpu.vector_store %arg6[%c0_11, %c0_12], %14 {strides = array<i32>} : memref<256x128xf32, #tpu.memory_space<vmem>>, vector<256x128xf32>,
    return
  }
  func.func @transform_0(%arg0: i32) -> (i32, i32) {
    %c0_i32 = arith.constant 0 : i32
    %c0_i32_0 = arith.constant 0 : i32
    return %arg0, %c0_i32 : i32, i32
  }
  func.func @transform_1(%arg0: i32) -> (i32, i32) {
    %c0_i32 = arith.constant 0 : i32
    %c0_i32_0 = arith.constant 0 : i32
    %c0_i32_1 = arith.constant 0 : i32
    return %c0_i32, %c0_i32_0 : i32, i32
  }
  func.func @transform_2(%arg0: i32) -> (i32, i32) {
    %c0_i32 = arith.constant 0 : i32
    %c0_i32_0 = arith.constant 0 : i32
    %c0_i32_1 = arith.constant 0 : i32
    return %c0_i32, %c0_i32_0 : i32, i32
  }
  func.func @transform_3(%arg0: i32) -> (i32, i32) {
    %c0_i32 = arith.constant 0 : i32
    %c0_i32_0 = arith.constant 0 : i32
    %c0_i32_1 = arith.constant 0 : i32
    return %c0_i32, %c0_i32_0 : i32, i32
  }
  func.func @transform_4(%arg0: i32) -> (i32, i32) {
    %c0_i32 = arith.constant 0 : i32
    %c0_i32_0 = arith.constant 0 : i32
    %c0_i32_1 = arith.constant 0 : i32
    return %c0_i32, %c0_i32_0 : i32, i32
  }
  func.func @transform_5(%arg0: i32) -> (i32, i32) {
    %c0_i32 = arith.constant 0 : i32
    %c0_i32_0 = arith.constant 0 : i32
    return %arg0, %c0_i32 : i32, i32
  }
}

module attributes {stable_mosaic.version = 11 : i64} {
  func.func @_mlp_resident_kernel(%arg0: i32, %arg1: memref<256x128xf32, #tpu.memory_space<vmem>>, %arg2: memref<128x256xbf16, #tpu.memory_space<vmem>>, %arg3: memref<1x256xf32, #tpu.memory_space<vmem>>, %arg4: memref<256x128xbf16, #tpu.memory_space<vmem>>, %arg5: memref<1x128xf32, #tpu.memory_space<vmem>>, %arg6: memref<256x128xf32, #tpu.memory_space<vmem>>) attributes {dimension_semantics = [#tpu.dimension_semantics<parallel>], iteration_bounds = array<i64: 1>, scalar_prefetch = 0 : i64, scratch_operands = 0 : i64, tpu.core_type = #tpu.core_type<tc>, window_params = [{transform_indices = @transform_0, window_bounds = array<i64: 256, 128>}, {pipeline_mode = #tpu.pipeline_mode<synchronous>, transform_indices = @transform_1, window_bounds = array<i64: 128, 256>}, {pipeline_mode = #tpu.pipeline_mode<synchronous>, transform_indices = @transform_2, window_bounds = array<i64: 1, 256>}, {pipeline_mode = #tpu.pipeline_mode<synchronous>, transform_indices = @transform_3, window_bounds = array<i64: 256, 128>}, {pipeline_mode = #tpu.pipeline_mode<synchronous>, transform_indices = @transform_4, window_bounds = array<i64: 1, 128>}, {transform_indices = @transform_5, window_bounds = array<i64: 256, 128>}]} {
    %c0 = arith.constant 0 : index
    %c0_0 = arith.constant 0 : index
    %0 = vector.load %arg1[%c0, %c0_0] : memref<256x128xf32, #tpu.memory_space<vmem>>, vector<256x128xf32>
    %1 = arith.truncf %0 : vector<256x128xf32> to vector<256x128xbf16>
    %c0_1 = arith.constant 0 : index
    %c0_2 = arith.constant 0 : index
    %2 = vector.load %arg2[%c0_1, %c0_2] : memref<128x256xbf16, #tpu.memory_space<vmem>>, vector<128x256xbf16>
    %cst = arith.constant dense<0.000000e+00> : vector<256x256xf32>
    %3 = tpu.matmul %1, %2, %cst {dimension_numbers = #tpu.dot_dimension_numbers<[1], [0], [0], [1], [0, 0, 1, 1], [], []>} : vector<256x128xbf16>, vector<128x256xbf16>, vector<256x256xf32> -> vector<256x256xf32>
    %c0_3 = arith.constant 0 : index
    %c0_4 = arith.constant 0 : index
    %4 = vector.load %arg3[%c0_3, %c0_4] : memref<1x256xf32, #tpu.memory_space<vmem>>, vector<1x256xf32>
    %5 = vector.broadcast %4 : vector<1x256xf32> to vector<256x256xf32>
    %6 = arith.addf %3, %5 : vector<256x256xf32>
    %cst_5 = arith.constant 0.000000e+00 : f32
    %7 = vector.broadcast %cst_5 : f32 to vector<256x256xf32>
    %8 = arith.maximumf %6, %7 : vector<256x256xf32>
    %9 = arith.truncf %8 : vector<256x256xf32> to vector<256x256xbf16>
    %c0_6 = arith.constant 0 : index
    %c0_7 = arith.constant 0 : index
    %10 = vector.load %arg4[%c0_6, %c0_7] : memref<256x128xbf16, #tpu.memory_space<vmem>>, vector<256x128xbf16>
    %cst_8 = arith.constant dense<0.000000e+00> : vector<256x128xf32>
    %11 = tpu.matmul %9, %10, %cst_8 {dimension_numbers = #tpu.dot_dimension_numbers<[1], [0], [0], [1], [0, 0, 1, 1], [], []>} : vector<256x256xbf16>, vector<256x128xbf16>, vector<256x128xf32> -> vector<256x128xf32>
    %c0_9 = arith.constant 0 : index
    %c0_10 = arith.constant 0 : index
    %12 = vector.load %arg5[%c0_9, %c0_10] : memref<1x128xf32, #tpu.memory_space<vmem>>, vector<1x128xf32>
    %13 = vector.broadcast %12 : vector<1x128xf32> to vector<256x128xf32>
    %14 = arith.addf %11, %13 : vector<256x128xf32>
    %c0_11 = arith.constant 0 : index
    %c0_12 = arith.constant 0 : index
    %15 = vector.load %arg6[%c0_11, %c0_12] : memref<256x128xf32, #tpu.memory_space<vmem>>, vector<256x128xf32>
    tpu.vector_store %arg6[%c0_11, %c0_12], %14 {strides = array<i32>} : memref<256x128xf32, #tpu.memory_space<vmem>>, vector<256x128xf32>,
    return
  }
  func.func @transform_0(%arg0: i32) -> (i32, i32) {
    %c0_i32 = arith.constant 0 : i32
    %c0_i32_0 = arith.constant 0 : i32
    return %arg0, %c0_i32 : i32, i32
  }
  func.func @transform_1(%arg0: i32) -> (i32, i32) {
    %c0_i32 = arith.constant 0 : i32
    %c0_i32_0 = arith.constant 0 : i32
    %c0_i32_1 = arith.constant 0 : i32
    return %c0_i32, %c0_i32_0 : i32, i32
  }
  func.func @transform_2(%arg0: i32) -> (i32, i32) {
    %c0_i32 = arith.constant 0 : i32
    %c0_i32_0 = arith.constant 0 : i32
    %c0_i32_1 = arith.constant 0 : i32
    return %c0_i32, %c0_i32_0 : i32, i32
  }
  func.func @transform_3(%arg0: i32) -> (i32, i32) {
    %c0_i32 = arith.constant 0 : i32
    %c0_i32_0 = arith.constant 0 : i32
    %c0_i32_1 = arith.constant 0 : i32
    return %c0_i32, %c0_i32_0 : i32, i32
  }
  func.func @transform_4(%arg0: i32) -> (i32, i32) {
    %c0_i32 = arith.constant 0 : i32
    %c0_i32_0 = arith.constant 0 : i32
    %c0_i32_1 = arith.constant 0 : i32
    return %c0_i32, %c0_i32_0 : i32, i32
  }
  func.func @transform_5(%arg0: i32) -> (i32, i32) {
    %c0_i32 = arith.constant 0 : i32
    %c0_i32_0 = arith.constant 0 : i32
    return %arg0, %c0_i32 : i32, i32
  }
}

</mosaic_0001>

<bundles_post_ra>
// kernel: _forward_impl.1
= control target key start
LH: loop header
LB: loop body
LE: loop exit
PB: predicated region body
PF: predicated region fallthrough
CT: control target
= control target key end

     0   :  { %10 = vsyncpa [#allocation3], 0  ;;  %s1369_s0 = inlined_call_operand.hbm [shape: f32[256,128], index: 0, kind: input, shape index: {}]   ;;  %s1370_s1 = inlined_call_operand.hbm [shape: bf16[128,256], index: 1, kind: input, shape index: {}]   ;;  %s1371_s2 = inlined_call_operand.vmem [shape: f32[1,256], index: 2, kind: input, shape index: {}]   ;;  %s1372_s3 = inlined_call_operand.hbm [shape: bf16[256,128], index: 3, kind: input, shape index: {}]   ;;  %s1373_s4 = inlined_call_operand.vmem [shape: f32[1,128], index: 4, kind: input, shape index: {}]   ;;  %s1374_s5 = inlined_call_operand.hbm [shape: f32[256,128], index: 5, kind: output, shape index: {}]  }
   0x1   :  { %11 = vsyncpa [#allocation6], 0 }
   0x2   :  { %12 = vsyncpa [#allocation4], 0  ;;  %s1142_s18 = smov [#allocation5]   ;;  %s1143_s20 = smov [#allocation2]  }
   0x3   :  { %s30_s19 = sshll.u32 %s1142_s18, 4  ;;  %s18_s21 = sshll.u32 %s1143_s20, 4  ;;  %s31_s19 = int_to_ptr.vmem [resolvable:$true] %s30_s19  ;;  %s1181_s21 = int_to_ptr.vmem [resolvable:$true] %s18_s21 }
   0x4   :  { %s1048_s24 = scalar_lea.hbm %s1370_s1, 2048 }
   0x5   :  { %p1049_p0 = scmp.ne.s32.totalorder %s1370_s1, %s1048_s24  ;;  %p1052_p1 = scmp.lt.u32.totalorder %s1048_s24, %s1370_s1 }
   0x7   :  { %p1054_p2 = pnand %p1052_p1, %p1049_p0 }
   0x9   :  { %1057 = shalt.err (!%p1054_p2)
}
   0xa   :  { %s1058_s29 = scalar_lea.vmem %s31_s19, 2048  ;;  %p1063_p4 = scmp.lt.s32.totalorder %s31_s19, %s31_s19 }
   0xb   :  { %p1059_p3 = scmp.ne.s32.totalorder %s31_s19, %s1058_s29  ;;  %p1064_p5 = scmp.lt.s32.totalorder %s1058_s29, %s1058_s29 }
   0xd   :  { %p1065_p6 = por %p1064_p5, %p1063_p4 }
   0xf   :  { %p1066_p7 = pnand %p1065_p6, %p1059_p3 }
  0x11   :  { %1069 = shalt.err (!%p1066_p7)
}
  0x12   :  { %s1144_s30 = smov 128   ;;  %s1145_s6 = smov 8  }
  0x13   :  { %36 = dma.hbm_to_vmem [thread:$0]  %s1370_s1, 2048, %s31_s19, [#allocation6], %s1144_s30, %s1144_s30, %s1145_s6  }
  0x14   :  { %s1070_s11 = scalar_lea.hbm %s1369_s0, 4096 }
  0x15   :  { %p1071_p8 = scmp.ne.s32.totalorder %s1369_s0, %s1070_s11  ;;  %p1074_p9 = scmp.lt.u32.totalorder %s1070_s11, %s1369_s0 }
  0x17   :  { %p1076_p10 = pnand %p1074_p9, %p1071_p8 }
  0x19   :  { %1079 = shalt.err (!%p1076_p10)
}
  0x1a   :  { %s1080_s16 = scalar_lea.vmem %s1181_s21, 4096  ;;  %p1085_p12 = scmp.lt.s32.totalorder %s1181_s21, %s1181_s21 }
  0x1b   :  { %p1081_p11 = scmp.ne.s32.totalorder %s1181_s21, %s1080_s16  ;;  %p1086_p13 = scmp.lt.s32.totalorder %s1080_s16, %s1080_s16 }
  0x1d   :  { %p1087_p0 = por %p1086_p13, %p1085_p12 }
  0x1f   :  { %p1088_p1 = pnand %p1087_p0, %p1081_p11 }
  0x21   :  { %1091 = shalt.err (!%p1088_p1)
}
  0x22   :  { %24 = dma.hbm_to_vmem [thread:$0]  %s1369_s0, 4096, %s1181_s21, [#allocation3], %s1144_s30, %s1144_s30, %s1145_s6  }
  0x23   :  { %s1146_s18 = smov [#allocation7]   ;;  %s1092_s23 = scalar_lea.hbm %s1372_s3, 2048 }
  0x24   :  { %s44_s19 = sshll.u32 %s1146_s18, 4  ;;  %p1093_p2 = scmp.ne.s32.totalorder %s1372_s3, %s1092_s23  ;;  %s45_s19 = int_to_ptr.vmem [resolvable:$true] %s44_s19 }
  0x25   :  { %p1096_p3 = scmp.lt.u32.totalorder %s1092_s23, %s1372_s3 }
  0x27   :  { %p1098_p4 = pnand %p1096_p3, %p1093_p2 }
  0x29   :  { %1101 = shalt.err (!%p1098_p4)
}
  0x2a   :  { %s1102_s28 = scalar_lea.vmem %s45_s19, 2048  ;;  %p1107_p6 = scmp.lt.s32.totalorder %s45_s19, %s45_s19 }
  0x2b   :  { %p1103_p5 = scmp.ne.s32.totalorder %s45_s19, %s1102_s28  ;;  %p1108_p7 = scmp.lt.s32.totalorder %s1102_s28, %s1102_s28 }
  0x2d   :  { %p1109_p8 = por %p1108_p7, %p1107_p6 }
  0x2f   :  { %p1110_p9 = pnand %p1109_p8, %p1103_p5 }
  0x31   :  { %1113 = shalt.err (!%p1110_p9)
}
  0x32   :  { %s1147_s0 = smov 64   ;;  %s1148_s21 = smov 4  }
  0x33   :  { %50 = dma.hbm_to_vmem [thread:$0]  %s1372_s3, 2048, %s45_s19, [#allocation6], %s1147_s0, %s1147_s0, %s1148_s21  }
  0x34   :  { %1136 = dma.done.wait [#allocation3], 4096  }
  0x35   :  { %1137 = vsyncadd [#allocation3], 4294963200 }
  0x36   :  { %1138 = dma.done.wait [#allocation6], 4096  }
  0x37   :  { %1139 = vsyncadd [#allocation6], 4294963200  ;;  %v1149_v0 = vmov 0   ;;  %v1008_v1 = vld [vmem:[#allocation5 + $0x4] ss:$8 sps:$4 sm:$0xff]   ;;  %v1036_v24 = vld [vmem:[#allocation7 + $0x50] sm:$0xff]  }
  0x38   :  { %251 = vmatprep.mubr.bf16.mxu0 %v1149_v0  ;;  %v1010_v2 = vld [vmem:[#allocation5] ss:$8 sps:$4 sm:$0xff]   ;;  %219 = vmatprep.subr.bf16.mxu0 %v1008_v1  ;;  %v1011_v3 = vld [vmem:[#allocation5 + $0x14] ss:$8 sps:$4 sm:$0xff]   ;;  %v1013_v4 = vld [vmem:[#allocation5 + $0x10] ss:$8 sps:$4 sm:$0xff]  }
  0x39   :  { %220 = vmatpush1.bf16.msra.mxu0 %v1010_v2  ;;  %v1014_v5 = vld [vmem:[#allocation5 + $0x24] ss:$8 sps:$4 sm:$0xff]   ;;  %v1016_v6 = vld [vmem:[#allocation5 + $0x20] ss:$8 sps:$4 sm:$0xff]   ;;  %v1017_v7 = vld [vmem:[#allocation5 + $0x34] ss:$8 sps:$4 sm:$0xff]  }
  0x3a   :  { %221 = vmatprep.subr.bf16.mxu0 %v1011_v3  ;;  %v1019_v8 = vld [vmem:[#allocation5 + $0x30] ss:$8 sps:$4 sm:$0xff]   ;;  %v1020_v9 = vld [vmem:[#allocation5 + $0x44] ss:$8 sps:$4 sm:$0xff]   ;;  %v1022_v10 = vld [vmem:[#allocation5 + $0x40] ss:$8 sps:$4 sm:$0xff]  }
  0x3b   :  { %v1023_v11 = vld [vmem:[#allocation5 + $0x54] ss:$8 sps:$4 sm:$0xff]   ;;  %v1025_v12 = vld [vmem:[#allocation5 + $0x50] ss:$8 sps:$4 sm:$0xff]   ;;  %v1026_v13 = vld [vmem:[#allocation5 + $0x64] ss:$8 sps:$4 sm:$0xff]  }
  0x3c   :  { %v1028_v14 = vld [vmem:[#allocation5 + $0x60] ss:$8 sps:$4 sm:$0xff]   ;;  %v1029_v15 = vld [vmem:[#allocation5 + $0x74] ss:$8 sps:$4 sm:$0xff]   ;;  %v1031_v19 = vld [vmem:[#allocation5 + $0x70] ss:$8 sps:$4 sm:$0xff]  }
  0x3d   :  { %222 = vmatpush1.bf16.msra.mxu0 %v1013_v4  ;;  %v1032_v16 = vld [vmem:[#allocation7 + $0x40] sm:$0xff]   ;;  %v1034_v18 = vld [vmem:[#allocation7 + $0x48] sm:$0xff]   ;;  %v1037_v25 = vld [vmem:[#allocation7 + $0x10] sm:$0xff]  }
  0x3e   :  { %223 = vmatprep.subr.bf16.mxu0 %v1014_v5  ;;  %v1033_v17 = vld [vmem:[#allocation7] sm:$0xff]   ;;  %v64_v21 = vld [vmem:[#allocation2 + $0x8] sm:$0xff]  ;;  %887 = vmatprep.subr.bf16.mxu1 %v1032_v16  ;;  %v1038_v26 = vld [vmem:[#allocation7 + $0x58] sm:$0xff]  }
  0x3f   :  { %v63_v20 = vld [vmem:[#allocation2] sm:$0xff]  ;;  %888 = vmatpush3.bf16.msra.mxu1 %v1033_v17  ;;  %v1035_v22 = vld [vmem:[#allocation7 + $0x8] sm:$0xff]   ;;  %v65_v27 = vld [vmem:[#allocation2 + $0x10] sm:$0xff] }
  0x40   :  { %v95_v23 = vpack.c.bf16 %v64_v21, %v63_v20  ;;  %889 = vmatprep.subr.bf16.mxu1 %v1034_v18  ;;  %v66_v28 = vld [vmem:[#allocation2 + $0x18] sm:$0xff]  ;;  %v1040_v31 = vld [vmem:[#allocation7 + $0x60] sm:$0xff]   ;;  %v1042_v33 = vld [vmem:[#allocation7 + $0x68] sm:$0xff]   ;;  %v129_v18 = vlaneseq }
  0x41   :  { %224 = vmatpush1.bf16.msra.mxu0 %v1016_v6  ;;  %v1039_v29 = vld [vmem:[#allocation7 + $0x18] sm:$0xff]   ;;  %v96_v30 = vpack.c.bf16 %v66_v28, %v65_v27  ;;  %v1041_v32 = vld [vmem:[#allocation7 + $0x20] sm:$0xff]   ;;  %v68_v35 = vld [vmem:[#allocation2 + $0x28] sm:$0xff] }
  0x42   :  { %225 = vmatprep.subr.bf16.mxu0 %v1017_v7  ;;  %v67_v34 = vld [vmem:[#allocation2 + $0x20] sm:$0xff]  ;;  %v69_v37 = vld [vmem:[#allocation2 + $0x30] sm:$0xff]  ;;  %v70_v38 = vld [vmem:[#allocation2 + $0x38] sm:$0xff] }
  0x43   :  { %890 = vmatpush3.bf16.msra.mxu1 %v1035_v22  ;;  %v97_v36 = vpack.c.bf16 %v68_v35, %v67_v34  ;;  %v98_v39 = vpack.c.bf16 %v70_v38, %v69_v37  ;;  %v71_v40 = vld [vmem:[#allocation2 + $0x40] sm:$0xff]  ;;  %v72_v41 = vld [vmem:[#allocation2 + $0x48] sm:$0xff]  ;;  %v73_v43 = vld [vmem:[#allocation2 + $0x50] sm:$0xff] }
  0x44   :  { %891 = vmatprep.subr.bf16.mxu1 %v1036_v24  ;;  %v99_v42 = vpack.c.bf16 %v72_v41, %v71_v40  ;;  %v74_v44 = vld [vmem:[#allocation2 + $0x58] sm:$0xff]  ;;  %v75_v46 = vld [vmem:[#allocation2 + $0x60] sm:$0xff]  ;;  %v76_v47 = vld [vmem:[#allocation2 + $0x68] sm:$0xff] }
  0x45   :  { %226 = vmatpush1.bf16.msra.mxu0 %v1019_v8  ;;  %v100_v45 = vpack.c.bf16 %v74_v44, %v73_v43  ;;  %v101_v48 = vpack.c.bf16 %v76_v47, %v75_v46  ;;  %v77_v49 = vld [vmem:[#allocation2 + $0x70] sm:$0xff]  ;;  %v78_v50 = vld [vmem:[#allocation2 + $0x78] sm:$0xff]  ;;  %v79_v52 = vld [vmem:[#allocation2 + $0x80] sm:$0xff] }
  0x46   :  { %227 = vmatprep.subr.bf16.mxu0 %v1020_v9  ;;  %v102_v51 = vpack.c.bf16 %v78_v50, %v77_v49  ;;  %v80_v53 = vld [vmem:[#allocation2 + $0x88] sm:$0xff]  ;;  %v81_v55 = vld [vmem:[#allocation2 + $0x90] sm:$0xff]  ;;  %v82_v56 = vld [vmem:[#allocation2 + $0x98] sm:$0xff] }
  0x47   :  { %892 = vmatpush3.bf16.msra.mxu1 %v1037_v25  ;;  %v103_v54 = vpack.c.bf16 %v80_v53, %v79_v52  ;;  %v104_v57 = vpack.c.bf16 %v82_v56, %v81_v55  ;;  %v83_v58 = vld [vmem:[#allocation2 + $0xa0] sm:$0xff]  ;;  %v84_v59 = vld [vmem:[#allocation2 + $0xa8] sm:$0xff]  ;;  %v85_v61 = vld [vmem:[#allocation2 + $0xb0] sm:$0xff] }
  0x48   :  { %893 = vmatprep.subr.bf16.mxu1 %v1038_v26  ;;  %v105_v60 = vpack.c.bf16 %v84_v59, %v83_v58  ;;  %v86_v62 = vld [vmem:[#allocation2 + $0xb8] sm:$0xff]  ;;  %v1043_v63 = vld [vmem:[#allocation7 + $0x28] sm:$0xff]   ;;  %v1044_v2 = vld [vmem:[#allocation7 + $0x70] sm:$0xff]  }
  0x49   :  { %228 = vmatpush1.bf16.msra.mxu0 %v1022_v10  ;;  %v106_v1 = vpack.c.bf16 %v86_v62, %v85_v61  ;;  %v1045_v3 = vld [vmem:[#allocation7 + $0x30] sm:$0xff]   ;;  %v1046_v4 = vld [vmem:[#allocation7 + $0x78] sm:$0xff]   ;;  %v87_v5 = vld [vmem:[#allocation2 + $0xc0] sm:$0xff] }
  0x4a   :  { %229 = vmatprep.subr.bf16.mxu0 %v1023_v11  ;;  %v88_v6 = vld [vmem:[#allocation2 + $0xc8] sm:$0xff]  ;;  %v1047_v7 = vld [vmem:[#allocation7 + $0x38] sm:$0xff]   ;;  %v89_v9 = vld [vmem:[#allocation2 + $0xd0] sm:$0xff] }
  0x4b   :  { %894 = vmatpush3.bf16.msra.mxu1 %v1039_v29  ;;  %v107_v8 = vpack.c.bf16 %v88_v6, %v87_v5  ;;  %v90_v10 = vld [vmem:[#allocation2 + $0xd8] sm:$0xff]  ;;  %v127_v21 = vld [vmem:[%s1371_s2] sm:$0x3] }
  0x4c   :  { %895 = vmatprep.subr.bf16.mxu1 %v1040_v31  ;;  %v108_v11 = vpack.c.bf16 %v90_v10, %v89_v9  ;;  %v94_v16 = vld [vmem:[#allocation2 + $0xf8] sm:$0xff] }
  0x4d   :  { %230 = vmatpush1.bf16.msra.mxu0 %v1025_v12  ;;  %v91_v12 = vld [vmem:[#allocation2 + $0xe0] sm:$0xff] }
  0x4e   :  { %231 = vmatprep.subr.bf16.mxu0 %v1026_v13  ;;  %v92_v13 = vld [vmem:[#allocation2 + $0xe8] sm:$0xff] }
  0x4f   :  { %896 = vmatpush3.bf16.msra.mxu1 %v1041_v32 }
  0x50   :  { %897 = vmatprep.subr.bf16.mxu1 %v1042_v33 }
  0x51   :  { %232 = vmatpush1.bf16.msra.mxu0 %v1028_v14  ;;  %v109_v14 = vpack.c.bf16 %v92_v13, %v91_v12 }
  0x52   :  { %233 = vmatprep.subr.bf16.mxu0 %v1029_v15  ;;  %v93_v15 = vld [vmem:[#allocation2 + $0xf0] sm:$0xff] }
  0x53   :  { %898 = vmatpush3.bf16.msra.mxu1 %v1043_v63  ;;  %v110_v17 = vpack.c.bf16 %v94_v16, %v93_v15 }
  0x54   :  { %899 = vmatprep.subr.bf16.mxu1 %v1044_v2 }
  0x55   :  { %234 = vmatpush1.bf16.msra.mxu0 %v1031_v19  ;;  %v130_v19 = vshrl.u32 %v129_v18, 7 }
  0x57   :  { %900 = vmatpush3.bf16.msra.mxu1 %v1045_v3  ;;  %v131_v20 = vsub.s32 0, %v130_v19  ;;  %v135_v22 = vsub.s32 1, %v130_v19 }
  0x58   :  { %252 = vmatmul.mubr.bf16.vlgmr.msra.gmra.mrb[0].mxu0 %v95_v23  ;;  %901 = vmatprep.subr.bf16.mxu1 %v1046_v4 }
  0x59   :  { %261 = vmatprep.mubr.bf16.mxu0 %v1149_v0  ;;  %v1249_v23 = vrot.slane %v127_v21, %v131_v20  ;;  %v1251_v24 = vrot.slane %v127_v21, %v135_v22 }
  0x5b   :  { %902 = vmatpush3.bf16.msra.mxu1 %v1047_v7 }
  0x60   :  { %262 = vmatmul.mubr.bf16.gmra.mrb[4].mxu0 %v96_v30 }
  0x61   :  { %271 = vmatprep.mubr.bf16.mxu0 %v1149_v0 }
  0x68   :  { %272 = vmatmul.mubr.bf16.gmra.mrb[8].mxu0 %v97_v36 }
  0x69   :  { %281 = vmatprep.mubr.bf16.mxu0 %v1149_v0 }
  0x70   :  { %282 = vmatmul.mubr.bf16.gmra.mrb[12].mxu0 %v98_v39 }
  0x71   :  { %291 = vmatprep.mubr.bf16.mxu0 %v1149_v0 }
  0x78   :  { %292 = vmatmul.mubr.bf16.gmra.mrb[16].mxu0 %v99_v42 }
  0x79   :  { %301 = vmatprep.mubr.bf16.mxu0 %v1149_v0 }
  0x80   :  { %302 = vmatmul.mubr.bf16.gmra.mrb[20].mxu0 %v100_v45 }
  0x81   :  { %311 = vmatprep.mubr.bf16.mxu0 %v1149_v0 }
  0x88   :  { %312 = vmatmul.mubr.bf16.gmra.mrb[24].mxu0 %v101_v48 }
  0x89   :  { %321 = vmatprep.mubr.bf16.mxu0 %v1149_v0 }
  0x90   :  { %322 = vmatmul.mubr.bf16.gmra.mrb[28].mxu0 %v102_v51 }
  0x91   :  { %331 = vmatprep.mubr.bf16.mxu0 %v1149_v0 }
  0x98   :  { %332 = vmatmul.mubr.bf16.gmra.mrb[32].mxu0 %v103_v54 }
  0x99   :  { %341 = vmatprep.mubr.bf16.mxu0 %v1149_v0 }
  0xa0   :  { %342 = vmatmul.mubr.bf16.gmra.mrb[36].mxu0 %v104_v57 }
  0xa1   :  { %351 = vmatprep.mubr.bf16.mxu0 %v1149_v0 }
  0xa8   :  { %352 = vmatmul.mubr.bf16.gmra.mrb[40].mxu0 %v105_v60 }
  0xa9   :  { %361 = vmatprep.mubr.bf16.mxu0 %v1149_v0 }
  0xb0   :  { %362 = vmatmul.mubr.bf16.gmra.mrb[44].mxu0 %v106_v1 }
  0xb1   :  { %371 = vmatprep.mubr.bf16.mxu0 %v1149_v0 }
  0xb8   :  { %372 = vmatmul.mubr.bf16.gmra.mrb[48].mxu0 %v107_v8 }
  0xb9   :  { %381 = vmatprep.mubr.bf16.mxu0 %v1149_v0 }
  0xc0   :  { %382 = vmatmul.mubr.bf16.gmra.mrb[52].mxu0 %v108_v11 }
  0xc1   :  { %391 = vmatprep.mubr.bf16.mxu0 %v1149_v0 }
  0xc8   :  { %392 = vmatmul.mubr.bf16.gmra.mrb[56].mxu0 %v109_v14 }
  0xc9   :  { %401 = vmatprep.mubr.bf16.mxu0 %v1149_v0 }
  0xd0   :  { %402 = vmatmul.mubr.bf16.gmra.mrb[60].mxu0 %v110_v17 }
 0x12b   :  { %v253_v25 = vpop.f32.mrb[0].mxu0 }
 0x12c   :  { %v254_v26 = vadd.f32 %v253_v25, %v1249_v23  ;;  %v255_v0 = vpop.f32.mrb[1].mxu0 }
 0x12d   :  { %v256_v27 = vadd.f32 %v255_v0, %v1251_v24  ;;  %v257_v28 = vpop.f32.mrb[2].mxu0 }
 0x12e   :  { %v258_v29 = vadd.f32 %v257_v28, %v1249_v23  ;;  %v259_v30 = vpop.f32.mrb[3].mxu0  ;;  %v412_v32 = vmax.f32 %v254_v26, 0.0 }
 0x12f   :  { %v260_v31 = vadd.f32 %v259_v30, %v1251_v24  ;;  %v413_v34 = vmax.f32 %v256_v27, 0.0 }
 0x130   :  { %v414_v33 = vmax.f32 %v258_v29, 0.0 }
 0x131   :  { %v415_v35 = vmax.f32 %v260_v31, 0.0 }
 0x132   :  { %v476_v36 = vpack.c.bf16 %v414_v33, %v412_v32 }
 0x133   :  { %v263_v37 = vpop.f32.mrb[4].mxu0  ;;  %v477_v38 = vpack.c.bf16 %v415_v35, %v413_v34 }
 0x134   :  { %v264_v39 = vadd.f32 %v263_v37, %v1249_v23  ;;  %v265_v40 = vpop.f32.mrb[5].mxu0 }
 0x135   :  { %v266_v41 = vadd.f32 %v265_v40, %v1251_v24  ;;  %v267_v42 = vpop.f32.mrb[6].mxu0  ;;  %675 = vmatprep.mubr.bf16.mxu1 %v477_v38 }
 0x136   :  { %v268_v43 = vadd.f32 %v267_v42, %v1249_v23  ;;  %v269_v44 = vpop.f32.mrb[7].mxu0  ;;  %676 = vmatmul.mubr.bf16.vlgmr.msra.gmra.mrb[0].mxu1 %v476_v36  ;;  %v416_v46 = vmax.f32 %v264_v39, 0.0 }
 0x137   :  { %v270_v45 = vadd.f32 %v269_v44, %v1251_v24  ;;  %v417_v48 = vmax.f32 %v266_v41, 0.0 }
 0x138   :  { %v418_v47 = vmax.f32 %v268_v43, 0.0 }
 0x139   :  { %v419_v49 = vmax.f32 %v270_v45, 0.0 }
 0x13a   :  { %v478_v50 = vpack.c.bf16 %v418_v47, %v416_v46 }
 0x13b   :  { %v479_v51 = vpack.c.bf16 %v419_v49, %v417_v48  ;;  %v273_v52 = vpop.f32.mrb[8].mxu0 }
 0x13c   :  { %v274_v53 = vadd.f32 %v273_v52, %v1249_v23  ;;  %v275_v54 = vpop.f32.mrb[9].mxu0 }
 0x13d   :  { %v276_v55 = vadd.f32 %v275_v54, %v1251_v24  ;;  %v277_v56 = vpop.f32.mrb[10].mxu0  ;;  %683 = vmatprep.mubr.bf16.mxu1 %v479_v51 }
 0x13e   :  { %v278_v57 = vadd.f32 %v277_v56, %v1249_v23  ;;  %v279_v58 = vpop.f32.mrb[11].mxu0  ;;  %684 = vmatmul.mubr.bf16.gmra.mrb[4].mxu1 %v478_v50  ;;  %v420_v60 = vmax.f32 %v274_v53, 0.0 }
 0x13f   :  { %v280_v59 = vadd.f32 %v279_v58, %v1251_v24  ;;  %v421_v62 = vmax.f32 %v276_v55, 0.0 }
 0x140   :  { %v422_v61 = vmax.f32 %v278_v57, 0.0 }
 0x141   :  { %v423_v63 = vmax.f32 %v280_v59, 0.0 }
 0x142   :  { %v480_v1 = vpack.c.bf16 %v422_v61, %v420_v60 }
 0x143   :  { %v481_v2 = vpack.c.bf16 %v423_v63, %v421_v62  ;;  %v283_v3 = vpop.f32.mrb[12].mxu0 }
 0x144   :  { %v284_v4 = vadd.f32 %v283_v3, %v1249_v23  ;;  %v285_v5 = vpop.f32.mrb[13].mxu0 }
 0x145   :  { %v286_v6 = vadd.f32 %v285_v5, %v1251_v24  ;;  %v287_v7 = vpop.f32.mrb[14].mxu0  ;;  %691 = vmatprep.mubr.bf16.mxu1 %v481_v2 }
 0x146   :  { %v288_v8 = vadd.f32 %v287_v7, %v1249_v23  ;;  %v289_v9 = vpop.f32.mrb[15].mxu0  ;;  %692 = vmatmul.mubr.bf16.gmra.mrb[8].mxu1 %v480_v1  ;;  %v424_v11 = vmax.f32 %v284_v4, 0.0 }
 0x147   :  { %v290_v10 = vadd.f32 %v289_v9, %v1251_v24  ;;  %v425_v13 = vmax.f32 %v286_v6, 0.0 }
 0x148   :  { %v426_v12 = vmax.f32 %v288_v8, 0.0 }
 0x149   :  { %v427_v14 = vmax.f32 %v290_v10, 0.0 }
 0x14a   :  { %v482_v15 = vpack.c.bf16 %v426_v12, %v424_v11 }
 0x14b   :  { %v483_v16 = vpack.c.bf16 %v427_v14, %v425_v13  ;;  %v293_v17 = vpop.f32.mrb[16].mxu0 }
 0x14c   :  { %v294_v18 = vadd.f32 %v293_v17, %v1249_v23  ;;  %v295_v19 = vpop.f32.mrb[17].mxu0 }
 0x14d   :  { %v296_v20 = vadd.f32 %v295_v19, %v1251_v24  ;;  %v297_v21 = vpop.f32.mrb[18].mxu0  ;;  %699 = vmatprep.mubr.bf16.mxu1 %v483_v16 }
 0x14e   :  { %v298_v22 = vadd.f32 %v297_v21, %v1249_v23  ;;  %v299_v25 = vpop.f32.mrb[19].mxu0  ;;  %700 = vmatmul.mubr.bf16.gmra.mrb[12].mxu1 %v482_v15  ;;  %v428_v0 = vmax.f32 %v294_v18, 0.0 }
 0x14f   :  { %v300_v26 = vadd.f32 %v299_v25, %v1251_v24  ;;  %v429_v28 = vmax.f32 %v296_v20, 0.0 }
 0x150   :  { %v430_v27 = vmax.f32 %v298_v22, 0.0 }
 0x151   :  { %v431_v29 = vmax.f32 %v300_v26, 0.0 }
 0x152   :  { %v484_v30 = vpack.c.bf16 %v430_v27, %v428_v0 }
 0x153   :  { %v485_v31 = vpack.c.bf16 %v431_v29, %v429_v28  ;;  %v303_v32 = vpop.f32.mrb[20].mxu0 }
 0x154   :  { %v304_v33 = vadd.f32 %v303_v32, %v1249_v23  ;;  %v305_v34 = vpop.f32.mrb[21].mxu0 }
 0x155   :  { %v306_v35 = vadd.f32 %v305_v34, %v1251_v24  ;;  %v307_v36 = vpop.f32.mrb[22].mxu0  ;;  %707 = vmatprep.mubr.bf16.mxu1 %v485_v31 }
 0x156   :  { %v308_v37 = vadd.f32 %v307_v36, %v1249_v23  ;;  %v309_v38 = vpop.f32.mrb[23].mxu0  ;;  %708 = vmatmul.mubr.bf16.gmra.mrb[16].mxu1 %v484_v30  ;;  %v432_v40 = vmax.f32 %v304_v33, 0.0 }
 0x157   :  { %v310_v39 = vadd.f32 %v309_v38, %v1251_v24  ;;  %v433_v42 = vmax.f32 %v306_v35, 0.0 }
 0x158   :  { %v434_v41 = vmax.f32 %v308_v37, 0.0 }
 0x159   :  { %v435_v43 = vmax.f32 %v310_v39, 0.0 }
 0x15a   :  { %v486_v44 = vpack.c.bf16 %v434_v41, %v432_v40 }
 0x15b   :  { %v487_v45 = vpack.c.bf16 %v435_v43, %v433_v42  ;;  %v313_v46 = vpop.f32.mrb[24].mxu0 }
 0x15c   :  { %v314_v47 = vadd.f32 %v313_v46, %v1249_v23  ;;  %v315_v48 = vpop.f32.mrb[25].mxu0 }
 0x15d   :  { %v316_v49 = vadd.f32 %v315_v48, %v1251_v24  ;;  %v317_v50 = vpop.f32.mrb[26].mxu0  ;;  %715 = vmatprep.mubr.bf16.mxu1 %v487_v45 }
 0x15e   :  { %v318_v51 = vadd.f32 %v317_v50, %v1249_v23  ;;  %v319_v52 = vpop.f32.mrb[27].mxu0  ;;  %716 = vmatmul.mubr.bf16.gmra.mrb[20].mxu1 %v486_v44  ;;  %v436_v54 = vmax.f32 %v314_v47, 0.0 }
 0x15f   :  { %v320_v53 = vadd.f32 %v319_v52, %v1251_v24  ;;  %v437_v56 = vmax.f32 %v316_v49, 0.0 }
 0x160   :  { %v438_v55 = vmax.f32 %v318_v51, 0.0 }
 0x161   :  { %v439_v57 = vmax.f32 %v320_v53, 0.0 }
 0x162   :  { %v488_v58 = vpack.c.bf16 %v438_v55, %v436_v54 }
 0x163   :  { %v489_v59 = vpack.c.bf16 %v439_v57, %v437_v56  ;;  %v323_v60 = vpop.f32.mrb[28].mxu0 }
 0x164   :  { %v324_v61 = vadd.f32 %v323_v60, %v1249_v23  ;;  %v325_v62 = vpop.f32.mrb[29].mxu0 }
 0x165   :  { %v326_v63 = vadd.f32 %v325_v62, %v1251_v24  ;;  %v327_v1 = vpop.f32.mrb[30].mxu0  ;;  %723 = vmatprep.mubr.bf16.mxu1 %v489_v59 }
 0x166   :  { %v328_v2 = vadd.f32 %v327_v1, %v1249_v23  ;;  %v329_v3 = vpop.f32.mrb[31].mxu0  ;;  %724 = vmatmul.mubr.bf16.gmra.mrb[24].mxu1 %v488_v58  ;;  %v440_v5 = vmax.f32 %v324_v61, 0.0 }
 0x167   :  { %v330_v4 = vadd.f32 %v329_v3, %v1251_v24  ;;  %v441_v7 = vmax.f32 %v326_v63, 0.0 }
 0x168   :  { %v442_v6 = vmax.f32 %v328_v2, 0.0 }
 0x169   :  { %v443_v8 = vmax.f32 %v330_v4, 0.0 }
 0x16a   :  { %v490_v9 = vpack.c.bf16 %v442_v6, %v440_v5 }
 0x16b   :  { %v491_v10 = vpack.c.bf16 %v443_v8, %v441_v7  ;;  %v333_v11 = vpop.f32.mrb[32].mxu0 }
 0x16c   :  { %v334_v12 = vadd.f32 %v333_v11, %v1249_v23  ;;  %v335_v13 = vpop.f32.mrb[33].mxu0 }
 0x16d   :  { %v336_v14 = vadd.f32 %v335_v13, %v1251_v24  ;;  %v337_v15 = vpop.f32.mrb[34].mxu0  ;;  %731 = vmatprep.mubr.bf16.mxu1 %v491_v10 }
 0x16e   :  { %v338_v16 = vadd.f32 %v337_v15, %v1249_v23  ;;  %v339_v17 = vpop.f32.mrb[35].mxu0  ;;  %732 = vmatmul.mubr.bf16.gmra.mrb[28].mxu1 %v490_v9  ;;  %v444_v19 = vmax.f32 %v334_v12, 0.0 }
 0x16f   :  { %v340_v18 = vadd.f32 %v339_v17, %v1251_v24  ;;  %v445_v21 = vmax.f32 %v336_v14, 0.0 }
 0x170   :  { %v446_v20 = vmax.f32 %v338_v16, 0.0 }
 0x171   :  { %v447_v22 = vmax.f32 %v340_v18, 0.0 }
 0x172   :  { %v492_v25 = vpack.c.bf16 %v446_v20, %v444_v19 }
 0x173   :  { %v493_v26 = vpack.c.bf16 %v447_v22, %v445_v21  ;;  %v343_v0 = vpop.f32.mrb[36].mxu0 }
 0x174   :  { %v344_v27 = vadd.f32 %v343_v0, %v1249_v23  ;;  %v345_v28 = vpop.f32.mrb[37].mxu0 }
 0x175   :  { %v346_v29 = vadd.f32 %v345_v28, %v1251_v24  ;;  %v347_v30 = vpop.f32.mrb[38].mxu0  ;;  %739 = vmatprep.mubr.bf16.mxu1 %v493_v26 }
 0x176   :  { %v348_v31 = vadd.f32 %v347_v30, %v1249_v23  ;;  %v349_v32 = vpop.f32.mrb[39].mxu0  ;;  %740 = vmatmul.mubr.bf16.gmra.mrb[32].mxu1 %v492_v25  ;;  %v448_v34 = vmax.f32 %v344_v27, 0.0 }
 0x177   :  { %v350_v33 = vadd.f32 %v349_v32, %v1251_v24  ;;  %v449_v36 = vmax.f32 %v346_v29, 0.0 }
 0x178   :  { %v450_v35 = vmax.f32 %v348_v31, 0.0 }
 0x179   :  { %v451_v37 = vmax.f32 %v350_v33, 0.0 }
 0x17a   :  { %v494_v38 = vpack.c.bf16 %v450_v35, %v448_v34 }
 0x17b   :  { %v495_v39 = vpack.c.bf16 %v451_v37, %v449_v36  ;;  %v353_v40 = vpop.f32.mrb[40].mxu0 }
 0x17c   :  { %v354_v41 = vadd.f32 %v353_v40, %v1249_v23  ;;  %v355_v42 = vpop.f32.mrb[41].mxu0 }
 0x17d   :  { %v356_v43 = vadd.f32 %v355_v42, %v1251_v24  ;;  %v357_v44 = vpop.f32.mrb[42].mxu0  ;;  %747 = vmatprep.mubr.bf16.mxu1 %v495_v39 }
 0x17e   :  { %v358_v45 = vadd.f32 %v357_v44, %v1249_v23  ;;  %v359_v46 = vpop.f32.mrb[43].mxu0  ;;  %748 = vmatmul.mubr.bf16.gmra.mrb[36].mxu1 %v494_v38  ;;  %v452_v48 = vmax.f32 %v354_v41, 0.0 }
 0x17f   :  { %v360_v47 = vadd.f32 %v359_v46, %v1251_v24  ;;  %v453_v50 = vmax.f32 %v356_v43, 0.0 }
 0x180   :  { %v454_v49 = vmax.f32 %v358_v45, 0.0 }
 0x181   :  { %v455_v51 = vmax.f32 %v360_v47, 0.0 }
 0x182   :  { %v496_v52 = vpack.c.bf16 %v454_v49, %v452_v48 }
 0x183   :  { %v497_v53 = vpack.c.bf16 %v455_v51, %v453_v50  ;;  %v363_v54 = vpop.f32.mrb[44].mxu0 }
 0x184   :  { %v364_v55 = vadd.f32 %v363_v54, %v1249_v23  ;;  %v365_v56 = vpop.f32.mrb[45].mxu0 }
 0x185   :  { %v366_v57 = vadd.f32 %v365_v56, %v1251_v24  ;;  %v367_v58 = vpop.f32.mrb[46].mxu0  ;;  %755 = vmatprep.mubr.bf16.mxu1 %v497_v53 }
 0x186   :  { %v368_v59 = vadd.f32 %v367_v58, %v1249_v23  ;;  %v369_v60 = vpop.f32.mrb[47].mxu0  ;;  %756 = vmatmul.mubr.bf16.gmra.mrb[40].mxu1 %v496_v52  ;;  %v456_v62 = vmax.f32 %v364_v55, 0.0 }
 0x187   :  { %v370_v61 = vadd.f32 %v369_v60, %v1251_v24  ;;  %v457_v1 = vmax.f32 %v366_v57, 0.0 }
 0x188   :  { %v458_v63 = vmax.f32 %v368_v59, 0.0 }
 0x189   :  { %v459_v2 = vmax.f32 %v370_v61, 0.0 }
 0x18a   :  { %v498_v3 = vpack.c.bf16 %v458_v63, %v456_v62  ;;  %v1320_v63 = vld [vmem:[%s1373_s4] ss:$0 sm:$0xff]  ;;  %s1150_s4 = smov [#allocation8]  }
 0x18b   :  { %v499_v4 = vpack.c.bf16 %v459_v2, %v457_v1  ;;  %v373_v5 = vpop.f32.mrb[48].mxu0  ;;  %s841_s10 = sshll.u32 %s1150_s4, 4  ;;  %s842_s10 = int_to_ptr.vmem [resolvable:$true] %s841_s10 }
 0x18c   :  { %v374_v6 = vadd.f32 %v373_v5, %v1249_v23  ;;  %v375_v7 = vpop.f32.mrb[49].mxu0  ;;  %s1114_s11 = scalar_lea.vmem %s842_s10, 4096  ;;  %p1119_p11 = scmp.lt.s32.totalorder %s842_s10, %s842_s10 }
 0x18d   :  { %v376_v8 = vadd.f32 %v375_v7, %v1251_v24  ;;  %v377_v9 = vpop.f32.mrb[50].mxu0  ;;  %763 = vmatprep.mubr.bf16.mxu1 %v499_v4  ;;  %p1115_p10 = scmp.ne.s32.totalorder %s842_s10, %s1114_s11  ;;  %p1120_p12 = scmp.lt.s32.totalorder %s1114_s11, %s1114_s11 }
 0x18e   :  { %v378_v10 = vadd.f32 %v377_v9, %v1249_v23  ;;  %v379_v11 = vpop.f32.mrb[51].mxu0  ;;  %764 = vmatmul.mubr.bf16.gmra.mrb[44].mxu1 %v498_v3  ;;  %v460_v13 = vmax.f32 %v374_v6, 0.0 }
 0x18f   :  { %v380_v12 = vadd.f32 %v379_v11, %v1251_v24  ;;  %v461_v15 = vmax.f32 %v376_v8, 0.0  ;;  %p1121_p13 = por %p1120_p12, %p1119_p11 }
 0x190   :  { %v462_v14 = vmax.f32 %v378_v10, 0.0 }
 0x191   :  { %v463_v16 = vmax.f32 %v380_v12, 0.0  ;;  %p1122_p0 = pnand %p1121_p13, %p1115_p10 }
 0x192   :  { %v500_v17 = vpack.c.bf16 %v462_v14, %v460_v13 }
 0x193   :  { %v501_v18 = vpack.c.bf16 %v463_v16, %v461_v15  ;;  %v383_v19 = vpop.f32.mrb[52].mxu0 }
 0x194   :  { %v384_v20 = vadd.f32 %v383_v19, %v1249_v23  ;;  %v385_v21 = vpop.f32.mrb[53].mxu0 }
 0x195   :  { %v386_v22 = vadd.f32 %v385_v21, %v1251_v24  ;;  %v387_v25 = vpop.f32.mrb[54].mxu0  ;;  %771 = vmatprep.mubr.bf16.mxu1 %v501_v18 }
 0x196   :  { %v388_v26 = vadd.f32 %v387_v25, %v1249_v23  ;;  %v389_v0 = vpop.f32.mrb[55].mxu0  ;;  %772 = vmatmul.mubr.bf16.gmra.mrb[48].mxu1 %v500_v17  ;;  %v464_v28 = vmax.f32 %v384_v20, 0.0 }
 0x197   :  { %v390_v27 = vadd.f32 %v389_v0, %v1251_v24  ;;  %v465_v30 = vmax.f32 %v386_v22, 0.0 }
 0x198   :  { %v466_v29 = vmax.f32 %v388_v26, 0.0 }
 0x199   :  { %v467_v31 = vmax.f32 %v390_v27, 0.0 }
 0x19a   :  { %v502_v32 = vpack.c.bf16 %v466_v29, %v464_v28 }
 0x19b   :  { %v503_v33 = vpack.c.bf16 %v467_v31, %v465_v30  ;;  %v393_v34 = vpop.f32.mrb[56].mxu0 }
 0x19c   :  { %v394_v35 = vadd.f32 %v393_v34, %v1249_v23  ;;  %v395_v36 = vpop.f32.mrb[57].mxu0 }
 0x19d   :  { %v396_v37 = vadd.f32 %v395_v36, %v1251_v24  ;;  %v397_v38 = vpop.f32.mrb[58].mxu0  ;;  %779 = vmatprep.mubr.bf16.mxu1 %v503_v33 }
 0x19e   :  { %v398_v39 = vadd.f32 %v397_v38, %v1249_v23  ;;  %v399_v40 = vpop.f32.mrb[59].mxu0  ;;  %780 = vmatmul.mubr.bf16.gmra.mrb[52].mxu1 %v502_v32  ;;  %v468_v42 = vmax.f32 %v394_v35, 0.0 }
 0x19f   :  { %v400_v41 = vadd.f32 %v399_v40, %v1251_v24  ;;  %v469_v44 = vmax.f32 %v396_v37, 0.0 }
 0x1a0   :  { %v470_v43 = vmax.f32 %v398_v39, 0.0 }
 0x1a1   :  { %v471_v45 = vmax.f32 %v400_v41, 0.0 }
 0x1a2   :  { %v504_v46 = vpack.c.bf16 %v470_v43, %v468_v42 }
 0x1a3   :  { %v505_v47 = vpack.c.bf16 %v471_v45, %v469_v44  ;;  %v403_v48 = vpop.f32.mrb[60].mxu0 }
 0x1a4   :  { %v404_v49 = vadd.f32 %v403_v48, %v1249_v23  ;;  %v405_v50 = vpop.f32.mrb[61].mxu0 }
 0x1a5   :  { %v406_v51 = vadd.f32 %v405_v50, %v1251_v24  ;;  %v407_v52 = vpop.f32.mrb[62].mxu0  ;;  %787 = vmatprep.mubr.bf16.mxu1 %v505_v47 }
 0x1a6   :  { %v408_v53 = vadd.f32 %v407_v52, %v1249_v23  ;;  %v409_v54 = vpop.f32.mrb[63].mxu0  ;;  %788 = vmatmul.mubr.bf16.gmra.mrb[56].mxu1 %v504_v46  ;;  %v472_v56 = vmax.f32 %v404_v49, 0.0 }
 0x1a7   :  { %v410_v55 = vadd.f32 %v409_v54, %v1251_v24  ;;  %v473_v58 = vmax.f32 %v406_v51, 0.0 }
 0x1a8   :  { %v474_v57 = vmax.f32 %v408_v53, 0.0 }
 0x1a9   :  { %v475_v59 = vmax.f32 %v410_v55, 0.0 }
 0x1aa   :  { %v506_v60 = vpack.c.bf16 %v474_v57, %v472_v56 }
 0x1ab   :  { %v507_v61 = vpack.c.bf16 %v475_v59, %v473_v58 }
 0x1ad   :  { %795 = vmatprep.mubr.bf16.mxu1 %v507_v61 }
 0x1ae   :  { %796 = vmatmul.mubr.bf16.gmra.mrb[60].mxu1 %v506_v60 }
 0x209   :  { %v903_v62 = vpop.f32.mrb[0].mxu1 }
 0x20a   :  { %v904_v1 = vpop.f32.mrb[1].mxu1 }
 0x20b   :  { %v905_v23 = vadd.f32 %v904_v1, %v903_v62  ;;  %v906_v2 = vpop.f32.mrb[2].mxu1 }
 0x20c   :  { %v907_v3 = vpop.f32.mrb[3].mxu1 }
 0x20d   :  { %v678_v24 = vadd.f32 %v905_v23, %v1320_v63  ;;  %v908_v4 = vadd.f32 %v907_v3, %v906_v2 }
 0x20f   :  { %804 = vst [vmem:[#allocation8] sm:$0xff] %v678_v24  ;;  %v681_v5 = vadd.f32 %v908_v4, %v1320_v63 }
 0x211   :  { %805 = vst [vmem:[#allocation8 + $0x8] sm:$0xff] %v681_v5  ;;  %v909_v6 = vpop.f32.mrb[4].mxu1 }
 0x212   :  { %v910_v7 = vpop.f32.mrb[5].mxu1 }
 0x213   :  { %v911_v8 = vadd.f32 %v910_v7, %v909_v6  ;;  %v912_v9 = vpop.f32.mrb[6].mxu1 }
 0x214   :  { %v913_v10 = vpop.f32.mrb[7].mxu1 }
 0x215   :  { %v686_v11 = vadd.f32 %v911_v8, %v1320_v63  ;;  %v914_v12 = vadd.f32 %v913_v10, %v912_v9 }
 0x217   :  { %806 = vst [vmem:[#allocation8 + $0x10] sm:$0xff] %v686_v11  ;;  %v689_v13 = vadd.f32 %v914_v12, %v1320_v63 }
 0x219   :  { %807 = vst [vmem:[#allocation8 + $0x18] sm:$0xff] %v689_v13  ;;  %v915_v14 = vpop.f32.mrb[8].mxu1 }
 0x21a   :  { %v916_v15 = vpop.f32.mrb[9].mxu1 }
 0x21b   :  { %v917_v16 = vadd.f32 %v916_v15, %v915_v14  ;;  %v918_v17 = vpop.f32.mrb[10].mxu1 }
 0x21c   :  { %v919_v18 = vpop.f32.mrb[11].mxu1 }
 0x21d   :  { %v694_v19 = vadd.f32 %v917_v16, %v1320_v63  ;;  %v920_v20 = vadd.f32 %v919_v18, %v918_v17 }
 0x21f   :  { %808 = vst [vmem:[#allocation8 + $0x20] sm:$0xff] %v694_v19  ;;  %v697_v21 = vadd.f32 %v920_v20, %v1320_v63 }
 0x221   :  { %809 = vst [vmem:[#allocation8 + $0x28] sm:$0xff] %v697_v21  ;;  %v921_v22 = vpop.f32.mrb[12].mxu1 }
 0x222   :  { %v922_v25 = vpop.f32.mrb[13].mxu1 }
 0x223   :  { %v923_v26 = vadd.f32 %v922_v25, %v921_v22  ;;  %v924_v0 = vpop.f32.mrb[14].mxu1 }
 0x224   :  { %v925_v27 = vpop.f32.mrb[15].mxu1 }
 0x225   :  { %v702_v28 = vadd.f32 %v923_v26, %v1320_v63  ;;  %v926_v29 = vadd.f32 %v925_v27, %v924_v0 }
 0x227   :  { %810 = vst [vmem:[#allocation8 + $0x30] sm:$0xff] %v702_v28  ;;  %v705_v30 = vadd.f32 %v926_v29, %v1320_v63 }
 0x229   :  { %811 = vst [vmem:[#allocation8 + $0x38] sm:$0xff] %v705_v30  ;;  %v927_v31 = vpop.f32.mrb[16].mxu1 }
 0x22a   :  { %v928_v32 = vpop.f32.mrb[17].mxu1 }
 0x22b   :  { %v929_v33 = vadd.f32 %v928_v32, %v927_v31  ;;  %v930_v34 = vpop.f32.mrb[18].mxu1 }
 0x22c   :  { %v931_v35 = vpop.f32.mrb[19].mxu1 }
 0x22d   :  { %v710_v36 = vadd.f32 %v929_v33, %v1320_v63  ;;  %v932_v37 = vadd.f32 %v931_v35, %v930_v34 }
 0x22f   :  { %812 = vst [vmem:[#allocation8 + $0x40] sm:$0xff] %v710_v36  ;;  %v713_v38 = vadd.f32 %v932_v37, %v1320_v63 }
 0x231   :  { %813 = vst [vmem:[#allocation8 + $0x48] sm:$0xff] %v713_v38  ;;  %v933_v39 = vpop.f32.mrb[20].mxu1 }
 0x232   :  { %v934_v40 = vpop.f32.mrb[21].mxu1 }
 0x233   :  { %v935_v41 = vadd.f32 %v934_v40, %v933_v39  ;;  %v936_v42 = vpop.f32.mrb[22].mxu1 }
 0x234   :  { %v937_v43 = vpop.f32.mrb[23].mxu1 }
 0x235   :  { %v718_v44 = vadd.f32 %v935_v41, %v1320_v63  ;;  %v938_v45 = vadd.f32 %v937_v43, %v936_v42 }
 0x237   :  { %814 = vst [vmem:[#allocation8 + $0x50] sm:$0xff] %v718_v44  ;;  %v721_v46 = vadd.f32 %v938_v45, %v1320_v63 }
 0x239   :  { %815 = vst [vmem:[#allocation8 + $0x58] sm:$0xff] %v721_v46  ;;  %v939_v47 = vpop.f32.mrb[24].mxu1 }
 0x23a   :  { %v940_v48 = vpop.f32.mrb[25].mxu1 }
 0x23b   :  { %v941_v49 = vadd.f32 %v940_v48, %v939_v47  ;;  %v942_v50 = vpop.f32.mrb[26].mxu1 }
 0x23c   :  { %v943_v51 = vpop.f32.mrb[27].mxu1 }
 0x23d   :  { %v726_v52 = vadd.f32 %v941_v49, %v1320_v63  ;;  %v944_v53 = vadd.f32 %v943_v51, %v942_v50 }
 0x23f   :  { %816 = vst [vmem:[#allocation8 + $0x60] sm:$0xff] %v726_v52  ;;  %v729_v54 = vadd.f32 %v944_v53, %v1320_v63 }
 0x241   :  { %817 = vst [vmem:[#allocation8 + $0x68] sm:$0xff] %v729_v54  ;;  %v945_v55 = vpop.f32.mrb[28].mxu1 }
 0x242   :  { %v946_v56 = vpop.f32.mrb[29].mxu1 }
 0x243   :  { %v947_v57 = vadd.f32 %v946_v56, %v945_v55  ;;  %v948_v58 = vpop.f32.mrb[30].mxu1 }
 0x244   :  { %v949_v59 = vpop.f32.mrb[31].mxu1 }
 0x245   :  { %v734_v60 = vadd.f32 %v947_v57, %v1320_v63  ;;  %v950_v61 = vadd.f32 %v949_v59, %v948_v58 }
 0x247   :  { %818 = vst [vmem:[#allocation8 + $0x70] sm:$0xff] %v734_v60  ;;  %v737_v62 = vadd.f32 %v950_v61, %v1320_v63 }
 0x249   :  { %819 = vst [vmem:[#allocation8 + $0x78] sm:$0xff] %v737_v62  ;;  %v951_v1 = vpop.f32.mrb[32].mxu1 }
 0x24a   :  { %v952_v23 = vpop.f32.mrb[33].mxu1 }
 0x24b   :  { %v953_v2 = vadd.f32 %v952_v23, %v951_v1  ;;  %v954_v3 = vpop.f32.mrb[34].mxu1 }
 0x24c   :  { %v955_v24 = vpop.f32.mrb[35].mxu1 }
 0x24d   :  { %v742_v4 = vadd.f32 %v953_v2, %v1320_v63  ;;  %v956_v5 = vadd.f32 %v955_v24, %v954_v3 }
 0x24f   :  { %820 = vst [vmem:[#allocation8 + $0x80] sm:$0xff] %v742_v4  ;;  %v745_v6 = vadd.f32 %v956_v5, %v1320_v63 }
 0x251   :  { %821 = vst [vmem:[#allocation8 + $0x88] sm:$0xff] %v745_v6  ;;  %v957_v7 = vpop.f32.mrb[36].mxu1 }
 0x252   :  { %v958_v8 = vpop.f32.mrb[37].mxu1 }
 0x253   :  { %v959_v9 = vadd.f32 %v958_v8, %v957_v7  ;;  %v960_v10 = vpop.f32.mrb[38].mxu1 }
 0x254   :  { %v961_v11 = vpop.f32.mrb[39].mxu1 }
 0x255   :  { %v750_v12 = vadd.f32 %v959_v9, %v1320_v63  ;;  %v962_v13 = vadd.f32 %v961_v11, %v960_v10 }
 0x257   :  { %822 = vst [vmem:[#allocation8 + $0x90] sm:$0xff] %v750_v12  ;;  %v753_v14 = vadd.f32 %v962_v13, %v1320_v63 }
 0x259   :  { %823 = vst [vmem:[#allocation8 + $0x98] sm:$0xff] %v753_v14  ;;  %v963_v15 = vpop.f32.mrb[40].mxu1 }
 0x25a   :  { %v964_v16 = vpop.f32.mrb[41].mxu1 }
 0x25b   :  { %v965_v17 = vadd.f32 %v964_v16, %v963_v15  ;;  %v966_v18 = vpop.f32.mrb[42].mxu1 }
 0x25c   :  { %v967_v19 = vpop.f32.mrb[43].mxu1 }
 0x25d   :  { %v758_v20 = vadd.f32 %v965_v17, %v1320_v63  ;;  %v968_v21 = vadd.f32 %v967_v19, %v966_v18 }
 0x25f   :  { %824 = vst [vmem:[#allocation8 + $0xa0] sm:$0xff] %v758_v20  ;;  %v761_v22 = vadd.f32 %v968_v21, %v1320_v63 }
 0x261   :  { %825 = vst [vmem:[#allocation8 + $0xa8] sm:$0xff] %v761_v22  ;;  %v969_v25 = vpop.f32.mrb[44].mxu1 }
 0x262   :  { %v970_v26 = vpop.f32.mrb[45].mxu1 }
 0x263   :  { %v971_v0 = vadd.f32 %v970_v26, %v969_v25  ;;  %v972_v27 = vpop.f32.mrb[46].mxu1 }
 0x264   :  { %v973_v28 = vpop.f32.mrb[47].mxu1 }
 0x265   :  { %v766_v29 = vadd.f32 %v971_v0, %v1320_v63  ;;  %v974_v30 = vadd.f32 %v973_v28, %v972_v27 }
 0x267   :  { %826 = vst [vmem:[#allocation8 + $0xb0] sm:$0xff] %v766_v29  ;;  %v769_v31 = vadd.f32 %v974_v30, %v1320_v63 }
 0x269   :  { %827 = vst [vmem:[#allocation8 + $0xb8] sm:$0xff] %v769_v31  ;;  %v975_v32 = vpop.f32.mrb[48].mxu1 }
 0x26a   :  { %v976_v33 = vpop.f32.mrb[49].mxu1 }
 0x26b   :  { %v977_v34 = vadd.f32 %v976_v33, %v975_v32  ;;  %v978_v35 = vpop.f32.mrb[50].mxu1 }
 0x26c   :  { %v979_v36 = vpop.f32.mrb[51].mxu1 }
 0x26d   :  { %v774_v37 = vadd.f32 %v977_v34, %v1320_v63  ;;  %v980_v38 = vadd.f32 %v979_v36, %v978_v35 }
 0x26f   :  { %828 = vst [vmem:[#allocation8 + $0xc0] sm:$0xff] %v774_v37  ;;  %v777_v39 = vadd.f32 %v980_v38, %v1320_v63 }
 0x271   :  { %829 = vst [vmem:[#allocation8 + $0xc8] sm:$0xff] %v777_v39  ;;  %v981_v40 = vpop.f32.mrb[52].mxu1 }
 0x272   :  { %v982_v41 = vpop.f32.mrb[53].mxu1 }
 0x273   :  { %v983_v42 = vadd.f32 %v982_v41, %v981_v40  ;;  %v984_v43 = vpop.f32.mrb[54].mxu1 }
 0x274   :  { %v985_v44 = vpop.f32.mrb[55].mxu1 }
 0x275   :  { %v782_v45 = vadd.f32 %v983_v42, %v1320_v63  ;;  %v986_v46 = vadd.f32 %v985_v44, %v984_v43 }
 0x277   :  { %830 = vst [vmem:[#allocation8 + $0xd0] sm:$0xff] %v782_v45  ;;  %v785_v47 = vadd.f32 %v986_v46, %v1320_v63 }
 0x279   :  { %831 = vst [vmem:[#allocation8 + $0xd8] sm:$0xff] %v785_v47  ;;  %v987_v48 = vpop.f32.mrb[56].mxu1 }
 0x27a   :  { %v988_v49 = vpop.f32.mrb[57].mxu1 }
 0x27b   :  { %v989_v50 = vadd.f32 %v988_v49, %v987_v48  ;;  %v990_v51 = vpop.f32.mrb[58].mxu1 }
 0x27c   :  { %v991_v52 = vpop.f32.mrb[59].mxu1 }
 0x27d   :  { %v790_v53 = vadd.f32 %v989_v50, %v1320_v63  ;;  %v992_v54 = vadd.f32 %v991_v52, %v990_v51 }
 0x27f   :  { %832 = vst [vmem:[#allocation8 + $0xe0] sm:$0xff] %v790_v53  ;;  %v793_v55 = vadd.f32 %v992_v54, %v1320_v63 }
 0x281   :  { %833 = vst [vmem:[#allocation8 + $0xe8] sm:$0xff] %v793_v55  ;;  %v993_v56 = vpop.f32.mrb[60].mxu1 }
 0x282   :  { %v994_v57 = vpop.f32.mrb[61].mxu1 }
 0x283   :  { %v995_v58 = vadd.f32 %v994_v57, %v993_v56  ;;  %v996_v59 = vpop.f32.mrb[62].mxu1 }
 0x284   :  { %v997_v60 = vpop.f32.mrb[63].mxu1 }
 0x285   :  { %v798_v61 = vadd.f32 %v995_v58, %v1320_v63  ;;  %v998_v62 = vadd.f32 %v997_v60, %v996_v59 }
 0x287   :  { %834 = vst [vmem:[#allocation8 + $0xf0] sm:$0xff] %v798_v61  ;;  %v801_v1 = vadd.f32 %v998_v62, %v1320_v63 }
 0x289   :  { %835 = vst [vmem:[#allocation8 + $0xf8] sm:$0xff] %v801_v1 }
 0x28a   :  { %1125 = shalt.err (!%p1122_p0)
}
 0x28b   :  { %s1126_s14 = scalar_lea.hbm %s1374_s5, 4096 }
 0x28c   :  { %p1127_p1 = scmp.ne.s32.totalorder %s1374_s5, %s1126_s14  ;;  %p1130_p2 = scmp.lt.u32.totalorder %s1126_s14, %s1374_s5 }
 0x28e   :  { %p1132_p3 = pnand %p1130_p2, %p1127_p1 }
 0x290   :  { %1135 = shalt.err (!%p1132_p3)
}
 0x291   :  { %847 = dma.vmem_to_hbm [thread:$0]  %s842_s10, 4096, %s1374_s5, [#allocation4], %s1144_s30, %s1144_s30, %s1145_s6  }
 0x292   :  { %1140 = dma.done.wait [#allocation4], 4096  }
 0x293   :  { %1141 = vsyncadd [#allocation4], 4294963200 }
 0x294   :  { %851 = vsyncpa [#allocation3], 1 }
 0x295   :  { %852 = vsyncpa [#allocation6], 1 }
 0x296   :  { %853 = vsyncpa [#allocation4], 1 }

// kernel: _forward_impl.1
= control target key start
LH: loop header
LB: loop body
LE: loop exit
PB: predicated region body
PF: predicated region fallthrough
CT: control target
= control target key end

     0   :  { %10 = vsyncpa [#allocation3], 0  ;;  %s1369_s0 = inlined_call_operand.hbm [shape: f32[256,128], index: 0, kind: input, shape index: {}]   ;;  %s1370_s1 = inlined_call_operand.hbm [shape: bf16[128,256], index: 1, kind: input, shape index: {}]   ;;  %s1371_s2 = inlined_call_operand.vmem [shape: f32[1,256], index: 2, kind: input, shape index: {}]   ;;  %s1372_s3 = inlined_call_operand.hbm [shape: bf16[256,128], index: 3, kind: input, shape index: {}]   ;;  %s1373_s4 = inlined_call_operand.vmem [shape: f32[1,128], index: 4, kind: input, shape index: {}]   ;;  %s1374_s5 = inlined_call_operand.hbm [shape: f32[256,128], index: 5, kind: output, shape index: {}]  }
   0x1   :  { %11 = vsyncpa [#allocation6], 0 }
   0x2   :  { %12 = vsyncpa [#allocation4], 0  ;;  %s1142_s18 = smov [#allocation5]   ;;  %s1143_s20 = smov [#allocation2]  }
   0x3   :  { %s30_s19 = sshll.u32 %s1142_s18, 4  ;;  %s18_s21 = sshll.u32 %s1143_s20, 4  ;;  %s31_s19 = int_to_ptr.vmem [resolvable:$true] %s30_s19  ;;  %s1181_s21 = int_to_ptr.vmem [resolvable:$true] %s18_s21 }
   0x4   :  { %s1048_s24 = scalar_lea.hbm %s1370_s1, 2048 }
   0x5   :  { %p1049_p0 = scmp.ne.s32.totalorder %s1370_s1, %s1048_s24  ;;  %p1052_p1 = scmp.lt.u32.totalorder %s1048_s24, %s1370_s1 }
   0x7   :  { %p1054_p2 = pnand %p1052_p1, %p1049_p0 }
   0x9   :  { %1057 = shalt.err (!%p1054_p2)
}
   0xa   :  { %s1058_s29 = scalar_lea.vmem %s31_s19, 2048  ;;  %p1063_p4 = scmp.lt.s32.totalorder %s31_s19, %s31_s19 }
   0xb   :  { %p1059_p3 = scmp.ne.s32.totalorder %s31_s19, %s1058_s29  ;;  %p1064_p5 = scmp.lt.s32.totalorder %s1058_s29, %s1058_s29 }
   0xd   :  { %p1065_p6 = por %p1064_p5, %p1063_p4 }
   0xf   :  { %p1066_p7 = pnand %p1065_p6, %p1059_p3 }
  0x11   :  { %1069 = shalt.err (!%p1066_p7)
}
  0x12   :  { %s1144_s30 = smov 128   ;;  %s1145_s6 = smov 8  }
  0x13   :  { %36 = dma.hbm_to_vmem [thread:$0]  %s1370_s1, 2048, %s31_s19, [#allocation6], %s1144_s30, %s1144_s30, %s1145_s6  }
  0x14   :  { %s1070_s11 = scalar_lea.hbm %s1369_s0, 4096 }
  0x15   :  { %p1071_p8 = scmp.ne.s32.totalorder %s1369_s0, %s1070_s11  ;;  %p1074_p9 = scmp.lt.u32.totalorder %s1070_s11, %s1369_s0 }
  0x17   :  { %p1076_p10 = pnand %p1074_p9, %p1071_p8 }
  0x19   :  { %1079 = shalt.err (!%p1076_p10)
}
  0x1a   :  { %s1080_s16 = scalar_lea.vmem %s1181_s21, 4096  ;;  %p1085_p12 = scmp.lt.s32.totalorder %s1181_s21, %s1181_s21 }
  0x1b   :  { %p1081_p11 = scmp.ne.s32.totalorder %s1181_s21, %s1080_s16  ;;  %p1086_p13 = scmp.lt.s32.totalorder %s1080_s16, %s1080_s16 }
  0x1d   :  { %p1087_p0 = por %p1086_p13, %p1085_p12 }
  0x1f   :  { %p1088_p1 = pnand %p1087_p0, %p1081_p11 }
  0x21   :  { %1091 = shalt.err (!%p1088_p1)
}
  0x22   :  { %24 = dma.hbm_to_vmem [thread:$0]  %s1369_s0, 4096, %s1181_s21, [#allocation3], %s1144_s30, %s1144_s30, %s1145_s6  }
  0x23   :  { %s1146_s18 = smov [#allocation7]   ;;  %s1092_s23 = scalar_lea.hbm %s1372_s3, 2048 }
  0x24   :  { %s44_s19 = sshll.u32 %s1146_s18, 4  ;;  %p1093_p2 = scmp.ne.s32.totalorder %s1372_s3, %s1092_s23  ;;  %s45_s19 = int_to_ptr.vmem [resolvable:$true] %s44_s19 }
  0x25   :  { %p1096_p3 = scmp.lt.u32.totalorder %s1092_s23, %s1372_s3 }
  0x27   :  { %p1098_p4 = pnand %p1096_p3, %p1093_p2 }
  0x29   :  { %1101 = shalt.err (!%p1098_p4)
}
  0x2a   :  { %s1102_s28 = scalar_lea.vmem %s45_s19, 2048  ;;  %p1107_p6 = scmp.lt.s32.totalorder %s45_s19, %s45_s19 }
  0x2b   :  { %p1103_p5 = scmp.ne.s32.totalorder %s45_s19, %s1102_s28  ;;  %p1108_p7 = scmp.lt.s32.totalorder %s1102_s28, %s1102_s28 }
  0x2d   :  { %p1109_p8 = por %p1108_p7, %p1107_p6 }
  0x2f   :  { %p1110_p9 = pnand %p1109_p8, %p1103_p5 }
  0x31   :  { %1113 = shalt.err (!%p1110_p9)
}
  0x32   :  { %s1147_s0 = smov 64   ;;  %s1148_s21 = smov 4  }
  0x33   :  { %50 = dma.hbm_to_vmem [thread:$0]  %s1372_s3, 2048, %s45_s19, [#allocation6], %s1147_s0, %s1147_s0, %s1148_s21  }
  0x34   :  { %1136 = dma.done.wait [#allocation3], 4096  }
  0x35   :  { %1137 = vsyncadd [#allocation3], 4294963200 }
  0x36   :  { %1138 = dma.done.wait [#allocation6], 4096  }
  0x37   :  { %1139 = vsyncadd [#allocation6], 4294963200  ;;  %v1149_v0 = vmov 0   ;;  %v1008_v1 = vld [vmem:[#allocation5 + $0x4] ss:$8 sps:$4 sm:$0xff]   ;;  %v1036_v24 = vld [vmem:[#allocation7 + $0x50] sm:$0xff]  }
  0x38   :  { %251 = vmatprep.mubr.bf16.mxu0 %v1149_v0  ;;  %v1010_v2 = vld [vmem:[#allocation5] ss:$8 sps:$4 sm:$0xff]   ;;  %219 = vmatprep.subr.bf16.mxu0 %v1008_v1  ;;  %v1011_v3 = vld [vmem:[#allocation5 + $0x14] ss:$8 sps:$4 sm:$0xff]   ;;  %v1013_v4 = vld [vmem:[#allocation5 + $0x10] ss:$8 sps:$4 sm:$0xff]  }
  0x39   :  { %220 = vmatpush1.bf16.msra.mxu0 %v1010_v2  ;;  %v1014_v5 = vld [vmem:[#allocation5 + $0x24] ss:$8 sps:$4 sm:$0xff]   ;;  %v1016_v6 = vld [vmem:[#allocation5 + $0x20] ss:$8 sps:$4 sm:$0xff]   ;;  %v1017_v7 = vld [vmem:[#allocation5 + $0x34] ss:$8 sps:$4 sm:$0xff]  }
  0x3a   :  { %221 = vmatprep.subr.bf16.mxu0 %v1011_v3  ;;  %v1019_v8 = vld [vmem:[#allocation5 + $0x30] ss:$8 sps:$4 sm:$0xff]   ;;  %v1020_v9 = vld [vmem:[#allocation5 + $0x44] ss:$8 sps:$4 sm:$0xff]   ;;  %v1022_v10 = vld [vmem:[#allocation5 + $0x40] ss:$8 sps:$4 sm:$0xff]  }
  0x3b   :  { %v1023_v11 = vld [vmem:[#allocation5 + $0x54] ss:$8 sps:$4 sm:$0xff]   ;;  %v1025_v12 = vld [vmem:[#allocation5 + $0x50] ss:$8 sps:$4 sm:$0xff]   ;;  %v1026_v13 = vld [vmem:[#allocation5 + $0x64] ss:$8 sps:$4 sm:$0xff]  }
  0x3c   :  { %v1028_v14 = vld [vmem:[#allocation5 + $0x60] ss:$8 sps:$4 sm:$0xff]   ;;  %v1029_v15 = vld [vmem:[#allocation5 + $0x74] ss:$8 sps:$4 sm:$0xff]   ;;  %v1031_v19 = vld [vmem:[#allocation5 + $0x70] ss:$8 sps:$4 sm:$0xff]  }
  0x3d   :  { %222 = vmatpush1.bf16.msra.mxu0 %v1013_v4  ;;  %v1032_v16 = vld [vmem:[#allocation7 + $0x40] sm:$0xff]   ;;  %v1034_v18 = vld [vmem:[#allocation7 + $0x48] sm:$0xff]   ;;  %v1037_v25 = vld [vmem:[#allocation7 + $0x10] sm:$0xff]  }
  0x3e   :  { %223 = vmatprep.subr.bf16.mxu0 %v1014_v5  ;;  %v1033_v17 = vld [vmem:[#allocation7] sm:$0xff]   ;;  %v64_v21 = vld [vmem:[#allocation2 + $0x8] sm:$0xff]  ;;  %887 = vmatprep.subr.bf16.mxu1 %v1032_v16  ;;  %v1038_v26 = vld [vmem:[#allocation7 + $0x58] sm:$0xff]  }
  0x3f   :  { %v63_v20 = vld [vmem:[#allocation2] sm:$0xff]  ;;  %888 = vmatpush3.bf16.msra.mxu1 %v1033_v17  ;;  %v1035_v22 = vld [vmem:[#allocation7 + $0x8] sm:$0xff]   ;;  %v65_v27 = vld [vmem:[#allocation2 + $0x10] sm:$0xff] }
  0x40   :  { %v95_v23 = vpack.c.bf16 %v64_v21, %v63_v20  ;;  %889 = vmatprep.subr.bf16.mxu1 %v1034_v18  ;;  %v66_v28 = vld [vmem:[#allocation2 + $0x18] sm:$0xff]  ;;  %v1040_v31 = vld [vmem:[#allocation7 + $0x60] sm:$0xff]   ;;  %v1042_v33 = vld [vmem:[#allocation7 + $0x68] sm:$0xff]   ;;  %v129_v18 = vlaneseq }
  0x41   :  { %224 = vmatpush1.bf16.msra.mxu0 %v1016_v6  ;;  %v1039_v29 = vld [vmem:[#allocation7 + $0x18] sm:$0xff]   ;;  %v96_v30 = vpack.c.bf16 %v66_v28, %v65_v27  ;;  %v1041_v32 = vld [vmem:[#allocation7 + $0x20] sm:$0xff]   ;;  %v68_v35 = vld [vmem:[#allocation2 + $0x28] sm:$0xff] }
  0x42   :  { %225 = vmatprep.subr.bf16.mxu0 %v1017_v7  ;;  %v67_v34 = vld [vmem:[#allocation2 + $0x20] sm:$0xff]  ;;  %v69_v37 = vld [vmem:[#allocation2 + $0x30] sm:$0xff]  ;;  %v70_v38 = vld [vmem:[#allocation2 + $0x38] sm:$0xff] }
  0x43   :  { %890 = vmatpush3.bf16.msra.mxu1 %v1035_v22  ;;  %v97_v36 = vpack.c.bf16 %v68_v35, %v67_v34  ;;  %v98_v39 = vpack.c.bf16 %v70_v38, %v69_v37  ;;  %v71_v40 = vld [vmem:[#allocation2 + $0x40] sm:$0xff]  ;;  %v72_v41 = vld [vmem:[#allocation2 + $0x48] sm:$0xff]  ;;  %v73_v43 = vld [vmem:[#allocation2 + $0x50] sm:$0xff] }
  0x44   :  { %891 = vmatprep.subr.bf16.mxu1 %v1036_v24  ;;  %v99_v42 = vpack.c.bf16 %v72_v41, %v71_v40  ;;  %v74_v44 = vld [vmem:[#allocation2 + $0x58] sm:$0xff]  ;;  %v75_v46 = vld [vmem:[#allocation2 + $0x60] sm:$0xff]  ;;  %v76_v47 = vld [vmem:[#allocation2 + $0x68] sm:$0xff] }
  0x45   :  { %226 = vmatpush1.bf16.msra.mxu0 %v1019_v8  ;;  %v100_v45 = vpack.c.bf16 %v74_v44, %v73_v43  ;;  %v101_v48 = vpack.c.bf16 %v76_v47, %v75_v46  ;;  %v77_v49 = vld [vmem:[#allocation2 + $0x70] sm:$0xff]  ;;  %v78_v50 = vld [vmem:[#allocation2 + $0x78] sm:$0xff]  ;;  %v79_v52 = vld [vmem:[#allocation2 + $0x80] sm:$0xff] }
  0x46   :  { %227 = vmatprep.subr.bf16.mxu0 %v1020_v9  ;;  %v102_v51 = vpack.c.bf16 %v78_v50, %v77_v49  ;;  %v80_v53 = vld [vmem:[#allocation2 + $0x88] sm:$0xff]  ;;  %v81_v55 = vld [vmem:[#allocation2 + $0x90] sm:$0xff]  ;;  %v82_v56 = vld [vmem:[#allocation2 + $0x98] sm:$0xff] }
  0x47   :  { %892 = vmatpush3.bf16.msra.mxu1 %v1037_v25  ;;  %v103_v54 = vpack.c.bf16 %v80_v53, %v79_v52  ;;  %v104_v57 = vpack.c.bf16 %v82_v56, %v81_v55  ;;  %v83_v58 = vld [vmem:[#allocation2 + $0xa0] sm:$0xff]  ;;  %v84_v59 = vld [vmem:[#allocation2 + $0xa8] sm:$0xff]  ;;  %v85_v61 = vld [vmem:[#allocation2 + $0xb0] sm:$0xff] }
  0x48   :  { %893 = vmatprep.subr.bf16.mxu1 %v1038_v26  ;;  %v105_v60 = vpack.c.bf16 %v84_v59, %v83_v58  ;;  %v86_v62 = vld [vmem:[#allocation2 + $0xb8] sm:$0xff]  ;;  %v1043_v63 = vld [vmem:[#allocation7 + $0x28] sm:$0xff]   ;;  %v1044_v2 = vld [vmem:[#allocation7 + $0x70] sm:$0xff]  }
  0x49   :  { %228 = vmatpush1.bf16.msra.mxu0 %v1022_v10  ;;  %v106_v1 = vpack.c.bf16 %v86_v62, %v85_v61  ;;  %v1045_v3 = vld [vmem:[#allocation7 + $0x30] sm:$0xff]   ;;  %v1046_v4 = vld [vmem:[#allocation7 + $0x78] sm:$0xff]   ;;  %v87_v5 = vld [vmem:[#allocation2 + $0xc0] sm:$0xff] }
  0x4a   :  { %229 = vmatprep.subr.bf16.mxu0 %v1023_v11  ;;  %v88_v6 = vld [vmem:[#allocation2 + $0xc8] sm:$0xff]  ;;  %v1047_v7 = vld [vmem:[#allocation7 + $0x38] sm:$0xff]   ;;  %v89_v9 = vld [vmem:[#allocation2 + $0xd0] sm:$0xff] }
  0x4b   :  { %894 = vmatpush3.bf16.msra.mxu1 %v1039_v29  ;;  %v107_v8 = vpack.c.bf16 %v88_v6, %v87_v5  ;;  %v90_v10 = vld [vmem:[#allocation2 + $0xd8] sm:$0xff]  ;;  %v127_v21 = vld [vmem:[%s1371_s2] sm:$0x3] }
  0x4c   :  { %895 = vmatprep.subr.bf16.mxu1 %v1040_v31  ;;  %v108_v11 = vpack.c.bf16 %v90_v10, %v89_v9  ;;  %v94_v16 = vld [vmem:[#allocation2 + $0xf8] sm:$0xff] }
  0x4d   :  { %230 = vmatpush1.bf16.msra.mxu0 %v1025_v12  ;;  %v91_v12 = vld [vmem:[#allocation2 + $0xe0] sm:$0xff] }
  0x4e   :  { %231 = vmatprep.subr.bf16.mxu0 %v1026_v13  ;;  %v92_v13 = vld [vmem:[#allocation2 + $0xe8] sm:$0xff] }
  0x4f   :  { %896 = vmatpush3.bf16.msra.mxu1 %v1041_v32 }
  0x50   :  { %897 = vmatprep.subr.bf16.mxu1 %v1042_v33 }
  0x51   :  { %232 = vmatpush1.bf16.msra.mxu0 %v1028_v14  ;;  %v109_v14 = vpack.c.bf16 %v92_v13, %v91_v12 }
  0x52   :  { %233 = vmatprep.subr.bf16.mxu0 %v1029_v15  ;;  %v93_v15 = vld [vmem:[#allocation2 + $0xf0] sm:$0xff] }
  0x53   :  { %898 = vmatpush3.bf16.msra.mxu1 %v1043_v63  ;;  %v110_v17 = vpack.c.bf16 %v94_v16, %v93_v15 }
  0x54   :  { %899 = vmatprep.subr.bf16.mxu1 %v1044_v2 }
  0x55   :  { %234 = vmatpush1.bf16.msra.mxu0 %v1031_v19  ;;  %v130_v19 = vshrl.u32 %v129_v18, 7 }
  0x57   :  { %900 = vmatpush3.bf16.msra.mxu1 %v1045_v3  ;;  %v131_v20 = vsub.s32 0, %v130_v19  ;;  %v135_v22 = vsub.s32 1, %v130_v19 }
  0x58   :  { %252 = vmatmul.mubr.bf16.vlgmr.msra.gmra.mrb[0].mxu0 %v95_v23  ;;  %901 = vmatprep.subr.bf16.mxu1 %v1046_v4 }
  0x59   :  { %261 = vmatprep.mubr.bf16.mxu0 %v1149_v0  ;;  %v1249_v23 = vrot.slane %v127_v21, %v131_v20  ;;  %v1251_v24 = vrot.slane %v127_v21, %v135_v22 }
  0x5b   :  { %902 = vmatpush3.bf16.msra.mxu1 %v1047_v7 }
  0x60   :  { %262 = vmatmul.mubr.bf16.gmra.mrb[4].mxu0 %v96_v30 }
  0x61   :  { %271 = vmatprep.mubr.bf16.mxu0 %v1149_v0 }
  0x68   :  { %272 = vmatmul.mubr.bf16.gmra.mrb[8].mxu0 %v97_v36 }
  0x69   :  { %281 = vmatprep.mubr.bf16.mxu0 %v1149_v0 }
  0x70   :  { %282 = vmatmul.mubr.bf16.gmra.mrb[12].mxu0 %v98_v39 }
  0x71   :  { %291 = vmatprep.mubr.bf16.mxu0 %v1149_v0 }
  0x78   :  { %292 = vmatmul.mubr.bf16.gmra.mrb[16].mxu0 %v99_v42 }
  0x79   :  { %301 = vmatprep.mubr.bf16.mxu0 %v1149_v0 }
  0x80   :  { %302 = vmatmul.mubr.bf16.gmra.mrb[20].mxu0 %v100_v45 }
  0x81   :  { %311 = vmatprep.mubr.bf16.mxu0 %v1149_v0 }
  0x88   :  { %312 = vmatmul.mubr.bf16.gmra.mrb[24].mxu0 %v101_v48 }
  0x89   :  { %321 = vmatprep.mubr.bf16.mxu0 %v1149_v0 }
  0x90   :  { %322 = vmatmul.mubr.bf16.gmra.mrb[28].mxu0 %v102_v51 }
  0x91   :  { %331 = vmatprep.mubr.bf16.mxu0 %v1149_v0 }
  0x98   :  { %332 = vmatmul.mubr.bf16.gmra.mrb[32].mxu0 %v103_v54 }
  0x99   :  { %341 = vmatprep.mubr.bf16.mxu0 %v1149_v0 }
  0xa0   :  { %342 = vmatmul.mubr.bf16.gmra.mrb[36].mxu0 %v104_v57 }
  0xa1   :  { %351 = vmatprep.mubr.bf16.mxu0 %v1149_v0 }
  0xa8   :  { %352 = vmatmul.mubr.bf16.gmra.mrb[40].mxu0 %v105_v60 }
  0xa9   :  { %361 = vmatprep.mubr.bf16.mxu0 %v1149_v0 }
  0xb0   :  { %362 = vmatmul.mubr.bf16.gmra.mrb[44].mxu0 %v106_v1 }
  0xb1   :  { %371 = vmatprep.mubr.bf16.mxu0 %v1149_v0 }
  0xb8   :  { %372 = vmatmul.mubr.bf16.gmra.mrb[48].mxu0 %v107_v8 }
  0xb9   :  { %381 = vmatprep.mubr.bf16.mxu0 %v1149_v0 }
  0xc0   :  { %382 = vmatmul.mubr.bf16.gmra.mrb[52].mxu0 %v108_v11 }
  0xc1   :  { %391 = vmatprep.mubr.bf16.mxu0 %v1149_v0 }
  0xc8   :  { %392 = vmatmul.mubr.bf16.gmra.mrb[56].mxu0 %v109_v14 }
  0xc9   :  { %401 = vmatprep.mubr.bf16.mxu0 %v1149_v0 }
  0xd0   :  { %402 = vmatmul.mubr.bf16.gmra.mrb[60].mxu0 %v110_v17 }
 0x12b   :  { %v253_v25 = vpop.f32.mrb[0].mxu0 }
 0x12c   :  { %v254_v26 = vadd.f32 %v253_v25, %v1249_v23  ;;  %v255_v0 = vpop.f32.mrb[1].mxu0 }
 0x12d   :  { %v256_v27 = vadd.f32 %v255_v0, %v1251_v24  ;;  %v257_v28 = vpop.f32.mrb[2].mxu0 }
 0x12e   :  { %v258_v29 = vadd.f32 %v257_v28, %v1249_v23  ;;  %v259_v30 = vpop.f32.mrb[3].mxu0  ;;  %v412_v32 = vmax.f32 %v254_v26, 0.0 }
 0x12f   :  { %v260_v31 = vadd.f32 %v259_v30, %v1251_v24  ;;  %v413_v34 = vmax.f32 %v256_v27, 0.0 }
 0x130   :  { %v414_v33 = vmax.f32 %v258_v29, 0.0 }
 0x131   :  { %v415_v35 = vmax.f32 %v260_v31, 0.0 }
 0x132   :  { %v476_v36 = vpack.c.bf16 %v414_v33, %v412_v32 }
 0x133   :  { %v263_v37 = vpop.f32.mrb[4].mxu0  ;;  %v477_v38 = vpack.c.bf16 %v415_v35, %v413_v34 }
 0x134   :  { %v264_v39 = vadd.f32 %v263_v37, %v1249_v23  ;;  %v265_v40 = vpop.f32.mrb[5].mxu0 }
 0x135   :  { %v266_v41 = vadd.f32 %v265_v40, %v1251_v24  ;;  %v267_v42 = vpop.f32.mrb[6].mxu0  ;;  %675 = vmatprep.mubr.bf16.mxu1 %v477_v38 }
 0x136   :  { %v268_v43 = vadd.f32 %v267_v42, %v1249_v23  ;;  %v269_v44 = vpop.f32.mrb[7].mxu0  ;;  %676 = vmatmul.mubr.bf16.vlgmr.msra.gmra.mrb[0].mxu1 %v476_v36  ;;  %v416_v46 = vmax.f32 %v264_v39, 0.0 }
 0x137   :  { %v270_v45 = vadd.f32 %v269_v44, %v1251_v24  ;;  %v417_v48 = vmax.f32 %v266_v41, 0.0 }
 0x138   :  { %v418_v47 = vmax.f32 %v268_v43, 0.0 }
 0x139   :  { %v419_v49 = vmax.f32 %v270_v45, 0.0 }
 0x13a   :  { %v478_v50 = vpack.c.bf16 %v418_v47, %v416_v46 }
 0x13b   :  { %v479_v51 = vpack.c.bf16 %v419_v49, %v417_v48  ;;  %v273_v52 = vpop.f32.mrb[8].mxu0 }
 0x13c   :  { %v274_v53 = vadd.f32 %v273_v52, %v1249_v23  ;;  %v275_v54 = vpop.f32.mrb[9].mxu0 }
 0x13d   :  { %v276_v55 = vadd.f32 %v275_v54, %v1251_v24  ;;  %v277_v56 = vpop.f32.mrb[10].mxu0  ;;  %683 = vmatprep.mubr.bf16.mxu1 %v479_v51 }
 0x13e   :  { %v278_v57 = vadd.f32 %v277_v56, %v1249_v23  ;;  %v279_v58 = vpop.f32.mrb[11].mxu0  ;;  %684 = vmatmul.mubr.bf16.gmra.mrb[4].mxu1 %v478_v50  ;;  %v420_v60 = vmax.f32 %v274_v53, 0.0 }
 0x13f   :  { %v280_v59 = vadd.f32 %v279_v58, %v1251_v24  ;;  %v421_v62 = vmax.f32 %v276_v55, 0.0 }
 0x140   :  { %v422_v61 = vmax.f32 %v278_v57, 0.0 }
 0x141   :  { %v423_v63 = vmax.f32 %v280_v59, 0.0 }
 0x142   :  { %v480_v1 = vpack.c.bf16 %v422_v61, %v420_v60 }
 0x143   :  { %v481_v2 = vpack.c.bf16 %v423_v63, %v421_v62  ;;  %v283_v3 = vpop.f32.mrb[12].mxu0 }
 0x144   :  { %v284_v4 = vadd.f32 %v283_v3, %v1249_v23  ;;  %v285_v5 = vpop.f32.mrb[13].mxu0 }
 0x145   :  { %v286_v6 = vadd.f32 %v285_v5, %v1251_v24  ;;  %v287_v7 = vpop.f32.mrb[14].mxu0  ;;  %691 = vmatprep.mubr.bf16.mxu1 %v481_v2 }
 0x146   :  { %v288_v8 = vadd.f32 %v287_v7, %v1249_v23  ;;  %v289_v9 = vpop.f32.mrb[15].mxu0  ;;  %692 = vmatmul.mubr.bf16.gmra.mrb[8].mxu1 %v480_v1  ;;  %v424_v11 = vmax.f32 %v284_v4, 0.0 }
 0x147   :  { %v290_v10 = vadd.f32 %v289_v9, %v1251_v24  ;;  %v425_v13 = vmax.f32 %v286_v6, 0.0 }
 0x148   :  { %v426_v12 = vmax.f32 %v288_v8, 0.0 }
 0x149   :  { %v427_v14 = vmax.f32 %v290_v10, 0.0 }
 0x14a   :  { %v482_v15 = vpack.c.bf16 %v426_v12, %v424_v11 }
 0x14b   :  { %v483_v16 = vpack.c.bf16 %v427_v14, %v425_v13  ;;  %v293_v17 = vpop.f32.mrb[16].mxu0 }
 0x14c   :  { %v294_v18 = vadd.f32 %v293_v17, %v1249_v23  ;;  %v295_v19 = vpop.f32.mrb[17].mxu0 }
 0x14d   :  { %v296_v20 = vadd.f32 %v295_v19, %v1251_v24  ;;  %v297_v21 = vpop.f32.mrb[18].mxu0  ;;  %699 = vmatprep.mubr.bf16.mxu1 %v483_v16 }
 0x14e   :  { %v298_v22 = vadd.f32 %v297_v21, %v1249_v23  ;;  %v299_v25 = vpop.f32.mrb[19].mxu0  ;;  %700 = vmatmul.mubr.bf16.gmra.mrb[12].mxu1 %v482_v15  ;;  %v428_v0 = vmax.f32 %v294_v18, 0.0 }
 0x14f   :  { %v300_v26 = vadd.f32 %v299_v25, %v1251_v24  ;;  %v429_v28 = vmax.f32 %v296_v20, 0.0 }
 0x150   :  { %v430_v27 = vmax.f32 %v298_v22, 0.0 }
 0x151   :  { %v431_v29 = vmax.f32 %v300_v26, 0.0 }
 0x152   :  { %v484_v30 = vpack.c.bf16 %v430_v27, %v428_v0 }
 0x153   :  { %v485_v31 = vpack.c.bf16 %v431_v29, %v429_v28  ;;  %v303_v32 = vpop.f32.mrb[20].mxu0 }
 0x154   :  { %v304_v33 = vadd.f32 %v303_v32, %v1249_v23  ;;  %v305_v34 = vpop.f32.mrb[21].mxu0 }
 0x155   :  { %v306_v35 = vadd.f32 %v305_v34, %v1251_v24  ;;  %v307_v36 = vpop.f32.mrb[22].mxu0  ;;  %707 = vmatprep.mubr.bf16.mxu1 %v485_v31 }
 0x156   :  { %v308_v37 = vadd.f32 %v307_v36, %v1249_v23  ;;  %v309_v38 = vpop.f32.mrb[23].mxu0  ;;  %708 = vmatmul.mubr.bf16.gmra.mrb[16].mxu1 %v484_v30  ;;  %v432_v40 = vmax.f32 %v304_v33, 0.0 }
 0x157   :  { %v310_v39 = vadd.f32 %v309_v38, %v1251_v24  ;;  %v433_v42 = vmax.f32 %v306_v35, 0.0 }
 0x158   :  { %v434_v41 = vmax.f32 %v308_v37, 0.0 }
 0x159   :  { %v435_v43 = vmax.f32 %v310_v39, 0.0 }
 0x15a   :  { %v486_v44 = vpack.c.bf16 %v434_v41, %v432_v40 }
 0x15b   :  { %v487_v45 = vpack.c.bf16 %v435_v43, %v433_v42  ;;  %v313_v46 = vpop.f32.mrb[24].mxu0 }
 0x15c   :  { %v314_v47 = vadd.f32 %v313_v46, %v1249_v23  ;;  %v315_v48 = vpop.f32.mrb[25].mxu0 }
 0x15d   :  { %v316_v49 = vadd.f32 %v315_v48, %v1251_v24  ;;  %v317_v50 = vpop.f32.mrb[26].mxu0  ;;  %715 = vmatprep.mubr.bf16.mxu1 %v487_v45 }
 0x15e   :  { %v318_v51 = vadd.f32 %v317_v50, %v1249_v23  ;;  %v319_v52 = vpop.f32.mrb[27].mxu0  ;;  %716 = vmatmul.mubr.bf16.gmra.mrb[20].mxu1 %v486_v44  ;;  %v436_v54 = vmax.f32 %v314_v47, 0.0 }
 0x15f   :  { %v320_v53 = vadd.f32 %v319_v52, %v1251_v24  ;;  %v437_v56 = vmax.f32 %v316_v49, 0.0 }
 0x160   :  { %v438_v55 = vmax.f32 %v318_v51, 0.0 }
 0x161   :  { %v439_v57 = vmax.f32 %v320_v53, 0.0 }
 0x162   :  { %v488_v58 = vpack.c.bf16 %v438_v55, %v436_v54 }
 0x163   :  { %v489_v59 = vpack.c.bf16 %v439_v57, %v437_v56  ;;  %v323_v60 = vpop.f32.mrb[28].mxu0 }
 0x164   :  { %v324_v61 = vadd.f32 %v323_v60, %v1249_v23  ;;  %v325_v62 = vpop.f32.mrb[29].mxu0 }
 0x165   :  { %v326_v63 = vadd.f32 %v325_v62, %v1251_v24  ;;  %v327_v1 = vpop.f32.mrb[30].mxu0  ;;  %723 = vmatprep.mubr.bf16.mxu1 %v489_v59 }
 0x166   :  { %v328_v2 = vadd.f32 %v327_v1, %v1249_v23  ;;  %v329_v3 = vpop.f32.mrb[31].mxu0  ;;  %724 = vmatmul.mubr.bf16.gmra.mrb[24].mxu1 %v488_v58  ;;  %v440_v5 = vmax.f32 %v324_v61, 0.0 }
 0x167   :  { %v330_v4 = vadd.f32 %v329_v3, %v1251_v24  ;;  %v441_v7 = vmax.f32 %v326_v63, 0.0 }
 0x168   :  { %v442_v6 = vmax.f32 %v328_v2, 0.0 }
 0x169   :  { %v443_v8 = vmax.f32 %v330_v4, 0.0 }
 0x16a   :  { %v490_v9 = vpack.c.bf16 %v442_v6, %v440_v5 }
 0x16b   :  { %v491_v10 = vpack.c.bf16 %v443_v8, %v441_v7  ;;  %v333_v11 = vpop.f32.mrb[32].mxu0 }
 0x16c   :  { %v334_v12 = vadd.f32 %v333_v11, %v1249_v23  ;;  %v335_v13 = vpop.f32.mrb[33].mxu0 }
 0x16d   :  { %v336_v14 = vadd.f32 %v335_v13, %v1251_v24  ;;  %v337_v15 = vpop.f32.mrb[34].mxu0  ;;  %731 = vmatprep.mubr.bf16.mxu1 %v491_v10 }
 0x16e   :  { %v338_v16 = vadd.f32 %v337_v15, %v1249_v23  ;;  %v339_v17 = vpop.f32.mrb[35].mxu0  ;;  %732 = vmatmul.mubr.bf16.gmra.mrb[28].mxu1 %v490_v9  ;;  %v444_v19 = vmax.f32 %v334_v12, 0.0 }
 0x16f   :  { %v340_v18 = vadd.f32 %v339_v17, %v1251_v24  ;;  %v445_v21 = vmax.f32 %v336_v14, 0.0 }
 0x170   :  { %v446_v20 = vmax.f32 %v338_v16, 0.0 }
 0x171   :  { %v447_v22 = vmax.f32 %v340_v18, 0.0 }
 0x172   :  { %v492_v25 = vpack.c.bf16 %v446_v20, %v444_v19 }
 0x173   :  { %v493_v26 = vpack.c.bf16 %v447_v22, %v445_v21  ;;  %v343_v0 = vpop.f32.mrb[36].mxu0 }
 0x174   :  { %v344_v27 = vadd.f32 %v343_v0, %v1249_v23  ;;  %v345_v28 = vpop.f32.mrb[37].mxu0 }
 0x175   :  { %v346_v29 = vadd.f32 %v345_v28, %v1251_v24  ;;  %v347_v30 = vpop.f32.mrb[38].mxu0  ;;  %739 = vmatprep.mubr.bf16.mxu1 %v493_v26 }
 0x176   :  { %v348_v31 = vadd.f32 %v347_v30, %v1249_v23  ;;  %v349_v32 = vpop.f32.mrb[39].mxu0  ;;  %740 = vmatmul.mubr.bf16.gmra.mrb[32].mxu1 %v492_v25  ;;  %v448_v34 = vmax.f32 %v344_v27, 0.0 }
 0x177   :  { %v350_v33 = vadd.f32 %v349_v32, %v1251_v24  ;;  %v449_v36 = vmax.f32 %v346_v29, 0.0 }
 0x178   :  { %v450_v35 = vmax.f32 %v348_v31, 0.0 }
 0x179   :  { %v451_v37 = vmax.f32 %v350_v33, 0.0 }
 0x17a   :  { %v494_v38 = vpack.c.bf16 %v450_v35, %v448_v34 }
 0x17b   :  { %v495_v39 = vpack.c.bf16 %v451_v37, %v449_v36  ;;  %v353_v40 = vpop.f32.mrb[40].mxu0 }
 0x17c   :  { %v354_v41 = vadd.f32 %v353_v40, %v1249_v23  ;;  %v355_v42 = vpop.f32.mrb[41].mxu0 }
 0x17d   :  { %v356_v43 = vadd.f32 %v355_v42, %v1251_v24  ;;  %v357_v44 = vpop.f32.mrb[42].mxu0  ;;  %747 = vmatprep.mubr.bf16.mxu1 %v495_v39 }
 0x17e   :  { %v358_v45 = vadd.f32 %v357_v44, %v1249_v23  ;;  %v359_v46 = vpop.f32.mrb[43].mxu0  ;;  %748 = vmatmul.mubr.bf16.gmra.mrb[36].mxu1 %v494_v38  ;;  %v452_v48 = vmax.f32 %v354_v41, 0.0 }
 0x17f   :  { %v360_v47 = vadd.f32 %v359_v46, %v1251_v24  ;;  %v453_v50 = vmax.f32 %v356_v43, 0.0 }
 0x180   :  { %v454_v49 = vmax.f32 %v358_v45, 0.0 }
 0x181   :  { %v455_v51 = vmax.f32 %v360_v47, 0.0 }
 0x182   :  { %v496_v52 = vpack.c.bf16 %v454_v49, %v452_v48 }
 0x183   :  { %v497_v53 = vpack.c.bf16 %v455_v51, %v453_v50  ;;  %v363_v54 = vpop.f32.mrb[44].mxu0 }
 0x184   :  { %v364_v55 = vadd.f32 %v363_v54, %v1249_v23  ;;  %v365_v56 = vpop.f32.mrb[45].mxu0 }
 0x185   :  { %v366_v57 = vadd.f32 %v365_v56, %v1251_v24  ;;  %v367_v58 = vpop.f32.mrb[46].mxu0  ;;  %755 = vmatprep.mubr.bf16.mxu1 %v497_v53 }
 0x186   :  { %v368_v59 = vadd.f32 %v367_v58, %v1249_v23  ;;  %v369_v60 = vpop.f32.mrb[47].mxu0  ;;  %756 = vmatmul.mubr.bf16.gmra.mrb[40].mxu1 %v496_v52  ;;  %v456_v62 = vmax.f32 %v364_v55, 0.0 }
 0x187   :  { %v370_v61 = vadd.f32 %v369_v60, %v1251_v24  ;;  %v457_v1 = vmax.f32 %v366_v57, 0.0 }
 0x188   :  { %v458_v63 = vmax.f32 %v368_v59, 0.0 }
 0x189   :  { %v459_v2 = vmax.f32 %v370_v61, 0.0 }
 0x18a   :  { %v498_v3 = vpack.c.bf16 %v458_v63, %v456_v62  ;;  %v1320_v63 = vld [vmem:[%s1373_s4] ss:$0 sm:$0xff]  ;;  %s1150_s4 = smov [#allocation8]  }
 0x18b   :  { %v499_v4 = vpack.c.bf16 %v459_v2, %v457_v1  ;;  %v373_v5 = vpop.f32.mrb[48].mxu0  ;;  %s841_s10 = sshll.u32 %s1150_s4, 4  ;;  %s842_s10 = int_to_ptr.vmem [resolvable:$true] %s841_s10 }
 0x18c   :  { %v374_v6 = vadd.f32 %v373_v5, %v1249_v23  ;;  %v375_v7 = vpop.f32.mrb[49].mxu0  ;;  %s1114_s11 = scalar_lea.vmem %s842_s10, 4096  ;;  %p1119_p11 = scmp.lt.s32.totalorder %s842_s10, %s842_s10 }
 0x18d   :  { %v376_v8 = vadd.f32 %v375_v7, %v1251_v24  ;;  %v377_v9 = vpop.f32.mrb[50].mxu0  ;;  %763 = vmatprep.mubr.bf16.mxu1 %v499_v4  ;;  %p1115_p10 = scmp.ne.s32.totalorder %s842_s10, %s1114_s11  ;;  %p1120_p12 = scmp.lt.s32.totalorder %s1114_s11, %s1114_s11 }
 0x18e   :  { %v378_v10 = vadd.f32 %v377_v9, %v1249_v23  ;;  %v379_v11 = vpop.f32.mrb[51].mxu0  ;;  %764 = vmatmul.mubr.bf16.gmra.mrb[44].mxu1 %v498_v3  ;;  %v460_v13 = vmax.f32 %v374_v6, 0.0 }
 0x18f   :  { %v380_v12 = vadd.f32 %v379_v11, %v1251_v24  ;;  %v461_v15 = vmax.f32 %v376_v8, 0.0  ;;  %p1121_p13 = por %p1120_p12, %p1119_p11 }
 0x190   :  { %v462_v14 = vmax.f32 %v378_v10, 0.0 }
 0x191   :  { %v463_v16 = vmax.f32 %v380_v12, 0.0  ;;  %p1122_p0 = pnand %p1121_p13, %p1115_p10 }
 0x192   :  { %v500_v17 = vpack.c.bf16 %v462_v14, %v460_v13 }
 0x193   :  { %v501_v18 = vpack.c.bf16 %v463_v16, %v461_v15  ;;  %v383_v19 = vpop.f32.mrb[52].mxu0 }
 0x194   :  { %v384_v20 = vadd.f32 %v383_v19, %v1249_v23  ;;  %v385_v21 = vpop.f32.mrb[53].mxu0 }
 0x195   :  { %v386_v22 = vadd.f32 %v385_v21, %v1251_v24  ;;  %v387_v25 = vpop.f32.mrb[54].mxu0  ;;  %771 = vmatprep.mubr.bf16.mxu1 %v501_v18 }
 0x196   :  { %v388_v26 = vadd.f32 %v387_v25, %v1249_v23  ;;  %v389_v0 = vpop.f32.mrb[55].mxu0  ;;  %772 = vmatmul.mubr.bf16.gmra.mrb[48].mxu1 %v500_v17  ;;  %v464_v28 = vmax.f32 %v384_v20, 0.0 }
 0x197   :  { %v390_v27 = vadd.f32 %v389_v0, %v1251_v24  ;;  %v465_v30 = vmax.f32 %v386_v22, 0.0 }
 0x198   :  { %v466_v29 = vmax.f32 %v388_v26, 0.0 }
 0x199   :  { %v467_v31 = vmax.f32 %v390_v27, 0.0 }
 0x19a   :  { %v502_v32 = vpack.c.bf16 %v466_v29, %v464_v28 }
 0x19b   :  { %v503_v33 = vpack.c.bf16 %v467_v31, %v465_v30  ;;  %v393_v34 = vpop.f32.mrb[56].mxu0 }
 0x19c   :  { %v394_v35 = vadd.f32 %v393_v34, %v1249_v23  ;;  %v395_v36 = vpop.f32.mrb[57].mxu0 }
 0x19d   :  { %v396_v37 = vadd.f32 %v395_v36, %v1251_v24  ;;  %v397_v38 = vpop.f32.mrb[58].mxu0  ;;  %779 = vmatprep.mubr.bf16.mxu1 %v503_v33 }
 0x19e   :  { %v398_v39 = vadd.f32 %v397_v38, %v1249_v23  ;;  %v399_v40 = vpop.f32.mrb[59].mxu0  ;;  %780 = vmatmul.mubr.bf16.gmra.mrb[52].mxu1 %v502_v32  ;;  %v468_v42 = vmax.f32 %v394_v35, 0.0 }
 0x19f   :  { %v400_v41 = vadd.f32 %v399_v40, %v1251_v24  ;;  %v469_v44 = vmax.f32 %v396_v37, 0.0 }
 0x1a0   :  { %v470_v43 = vmax.f32 %v398_v39, 0.0 }
 0x1a1   :  { %v471_v45 = vmax.f32 %v400_v41, 0.0 }
 0x1a2   :  { %v504_v46 = vpack.c.bf16 %v470_v43, %v468_v42 }
 0x1a3   :  { %v505_v47 = vpack.c.bf16 %v471_v45, %v469_v44  ;;  %v403_v48 = vpop.f32.mrb[60].mxu0 }
 0x1a4   :  { %v404_v49 = vadd.f32 %v403_v48, %v1249_v23  ;;  %v405_v50 = vpop.f32.mrb[61].mxu0 }
 0x1a5   :  { %v406_v51 = vadd.f32 %v405_v50, %v1251_v24  ;;  %v407_v52 = vpop.f32.mrb[62].mxu0  ;;  %787 = vmatprep.mubr.bf16.mxu1 %v505_v47 }
 0x1a6   :  { %v408_v53 = vadd.f32 %v407_v52, %v1249_v23  ;;  %v409_v54 = vpop.f32.mrb[63].mxu0  ;;  %788 = vmatmul.mubr.bf16.gmra.mrb[56].mxu1 %v504_v46  ;;  %v472_v56 = vmax.f32 %v404_v49, 0.0 }
 0x1a7   :  { %v410_v55 = vadd.f32 %v409_v54, %v1251_v24  ;;  %v473_v58 = vmax.f32 %v406_v51, 0.0 }
 0x1a8   :  { %v474_v57 = vmax.f32 %v408_v53, 0.0 }
 0x1a9   :  { %v475_v59 = vmax.f32 %v410_v55, 0.0 }
 0x1aa   :  { %v506_v60 = vpack.c.bf16 %v474_v57, %v472_v56 }
 0x1ab   :  { %v507_v61 = vpack.c.bf16 %v475_v59, %v473_v58 }
 0x1ad   :  { %795 = vmatprep.mubr.bf16.mxu1 %v507_v61 }
 0x1ae   :  { %796 = vmatmul.mubr.bf16.gmra.mrb[60].mxu1 %v506_v60 }
 0x209   :  { %v903_v62 = vpop.f32.mrb[0].mxu1 }
 0x20a   :  { %v904_v1 = vpop.f32.mrb[1].mxu1 }
 0x20b   :  { %v905_v23 = vadd.f32 %v904_v1, %v903_v62  ;;  %v906_v2 = vpop.f32.mrb[2].mxu1 }
 0x20c   :  { %v907_v3 = vpop.f32.mrb[3].mxu1 }
 0x20d   :  { %v678_v24 = vadd.f32 %v905_v23, %v1320_v63  ;;  %v908_v4 = vadd.f32 %v907_v3, %v906_v2 }
 0x20f   :  { %804 = vst [vmem:[#allocation8] sm:$0xff] %v678_v24  ;;  %v681_v5 = vadd.f32 %v908_v4, %v1320_v63 }
 0x211   :  { %805 = vst [vmem:[#allocation8 + $0x8] sm:$0xff] %v681_v5  ;;  %v909_v6 = vpop.f32.mrb[4].mxu1 }
 0x212   :  { %v910_v7 = vpop.f32.mrb[5].mxu1 }
 0x213   :  { %v911_v8 = vadd.f32 %v910_v7, %v909_v6  ;;  %v912_v9 = vpop.f32.mrb[6].mxu1 }
 0x214   :  { %v913_v10 = vpop.f32.mrb[7].mxu1 }
 0x215   :  { %v686_v11 = vadd.f32 %v911_v8, %v1320_v63  ;;  %v914_v12 = vadd.f32 %v913_v10, %v912_v9 }
 0x217   :  { %806 = vst [vmem:[#allocation8 + $0x10] sm:$0xff] %v686_v11  ;;  %v689_v13 = vadd.f32 %v914_v12, %v1320_v63 }
 0x219   :  { %807 = vst [vmem:[#allocation8 + $0x18] sm:$0xff] %v689_v13  ;;  %v915_v14 = vpop.f32.mrb[8].mxu1 }
 0x21a   :  { %v916_v15 = vpop.f32.mrb[9].mxu1 }
 0x21b   :  { %v917_v16 = vadd.f32 %v916_v15, %v915_v14  ;;  %v918_v17 = vpop.f32.mrb[10].mxu1 }
 0x21c   :  { %v919_v18 = vpop.f32.mrb[11].mxu1 }
 0x21d   :  { %v694_v19 = vadd.f32 %v917_v16, %v1320_v63  ;;  %v920_v20 = vadd.f32 %v919_v18, %v918_v17 }
 0x21f   :  { %808 = vst [vmem:[#allocation8 + $0x20] sm:$0xff] %v694_v19  ;;  %v697_v21 = vadd.f32 %v920_v20, %v1320_v63 }
 0x221   :  { %809 = vst [vmem:[#allocation8 + $0x28] sm:$0xff] %v697_v21  ;;  %v921_v22 = vpop.f32.mrb[12].mxu1 }
 0x222   :  { %v922_v25 = vpop.f32.mrb[13].mxu1 }
 0x223   :  { %v923_v26 = vadd.f32 %v922_v25, %v921_v22  ;;  %v924_v0 = vpop.f32.mrb[14].mxu1 }
 0x224   :  { %v925_v27 = vpop.f32.mrb[15].mxu1 }
 0x225   :  { %v702_v28 = vadd.f32 %v923_v26, %v1320_v63  ;;  %v926_v29 = vadd.f32 %v925_v27, %v924_v0 }
 0x227   :  { %810 = vst [vmem:[#allocation8 + $0x30] sm:$0xff] %v702_v28  ;;  %v705_v30 = vadd.f32 %v926_v29, %v1320_v63 }
 0x229   :  { %811 = vst [vmem:[#allocation8 + $0x38] sm:$0xff] %v705_v30  ;;  %v927_v31 = vpop.f32.mrb[16].mxu1 }
 0x22a   :  { %v928_v32 = vpop.f32.mrb[17].mxu1 }
 0x22b   :  { %v929_v33 = vadd.f32 %v928_v32, %v927_v31  ;;  %v930_v34 = vpop.f32.mrb[18].mxu1 }
 0x22c   :  { %v931_v35 = vpop.f32.mrb[19].mxu1 }
 0x22d   :  { %v710_v36 = vadd.f32 %v929_v33, %v1320_v63  ;;  %v932_v37 = vadd.f32 %v931_v35, %v930_v34 }
 0x22f   :  { %812 = vst [vmem:[#allocation8 + $0x40] sm:$0xff] %v710_v36  ;;  %v713_v38 = vadd.f32 %v932_v37, %v1320_v63 }
 0x231   :  { %813 = vst [vmem:[#allocation8 + $0x48] sm:$0xff] %v713_v38  ;;  %v933_v39 = vpop.f32.mrb[20].mxu1 }
 0x232   :  { %v934_v40 = vpop.f32.mrb[21].mxu1 }
 0x233   :  { %v935_v41 = vadd.f32 %v934_v40, %v933_v39  ;;  %v936_v42 = vpop.f32.mrb[22].mxu1 }
 0x234   :  { %v937_v43 = vpop.f32.mrb[23].mxu1 }
 0x235   :  { %v718_v44 = vadd.f32 %v935_v41, %v1320_v63  ;;  %v938_v45 = vadd.f32 %v937_v43, %v936_v42 }
 0x237   :  { %814 = vst [vmem:[#allocation8 + $0x50] sm:$0xff] %v718_v44  ;;  %v721_v46 = vadd.f32 %v938_v45, %v1320_v63 }
 0x239   :  { %815 = vst [vmem:[#allocation8 + $0x58] sm:$0xff] %v721_v46  ;;  %v939_v47 = vpop.f32.mrb[24].mxu1 }
 0x23a   :  { %v940_v48 = vpop.f32.mrb[25].mxu1 }
 0x23b   :  { %v941_v49 = vadd.f32 %v940_v48, %v939_v47  ;;  %v942_v50 = vpop.f32.mrb[26].mxu1 }
 0x23c   :  { %v943_v51 = vpop.f32.mrb[27].mxu1 }
 0x23d   :  { %v726_v52 = vadd.f32 %v941_v49, %v1320_v63  ;;  %v944_v53 = vadd.f32 %v943_v51, %v942_v50 }
 0x23f   :  { %816 = vst [vmem:[#allocation8 + $0x60] sm:$0xff] %v726_v52  ;;  %v729_v54 = vadd.f32 %v944_v53, %v1320_v63 }
 0x241   :  { %817 = vst [vmem:[#allocation8 + $0x68] sm:$0xff] %v729_v54  ;;  %v945_v55 = vpop.f32.mrb[28].mxu1 }
 0x242   :  { %v946_v56 = vpop.f32.mrb[29].mxu1 }
 0x243   :  { %v947_v57 = vadd.f32 %v946_v56, %v945_v55  ;;  %v948_v58 = vpop.f32.mrb[30].mxu1 }
 0x244   :  { %v949_v59 = vpop.f32.mrb[31].mxu1 }
 0x245   :  { %v734_v60 = vadd.f32 %v947_v57, %v1320_v63  ;;  %v950_v61 = vadd.f32 %v949_v59, %v948_v58 }
 0x247   :  { %818 = vst [vmem:[#allocation8 + $0x70] sm:$0xff] %v734_v60  ;;  %v737_v62 = vadd.f32 %v950_v61, %v1320_v63 }
 0x249   :  { %819 = vst [vmem:[#allocation8 + $0x78] sm:$0xff] %v737_v62  ;;  %v951_v1 = vpop.f32.mrb[32].mxu1 }
 0x24a   :  { %v952_v23 = vpop.f32.mrb[33].mxu1 }
 0x24b   :  { %v953_v2 = vadd.f32 %v952_v23, %v951_v1  ;;  %v954_v3 = vpop.f32.mrb[34].mxu1 }
 0x24c   :  { %v955_v24 = vpop.f32.mrb[35].mxu1 }
 0x24d   :  { %v742_v4 = vadd.f32 %v953_v2, %v1320_v63  ;;  %v956_v5 = vadd.f32 %v955_v24, %v954_v3 }
 0x24f   :  { %820 = vst [vmem:[#allocation8 + $0x80] sm:$0xff] %v742_v4  ;;  %v745_v6 = vadd.f32 %v956_v5, %v1320_v63 }
 0x251   :  { %821 = vst [vmem:[#allocation8 + $0x88] sm:$0xff] %v745_v6  ;;  %v957_v7 = vpop.f32.mrb[36].mxu1 }
 0x252   :  { %v958_v8 = vpop.f32.mrb[37].mxu1 }
 0x253   :  { %v959_v9 = vadd.f32 %v958_v8, %v957_v7  ;;  %v960_v10 = vpop.f32.mrb[38].mxu1 }
 0x254   :  { %v961_v11 = vpop.f32.mrb[39].mxu1 }
 0x255   :  { %v750_v12 = vadd.f32 %v959_v9, %v1320_v63  ;;  %v962_v13 = vadd.f32 %v961_v11, %v960_v10 }
 0x257   :  { %822 = vst [vmem:[#allocation8 + $0x90] sm:$0xff] %v750_v12  ;;  %v753_v14 = vadd.f32 %v962_v13, %v1320_v63 }
 0x259   :  { %823 = vst [vmem:[#allocation8 + $0x98] sm:$0xff] %v753_v14  ;;  %v963_v15 = vpop.f32.mrb[40].mxu1 }
 0x25a   :  { %v964_v16 = vpop.f32.mrb[41].mxu1 }
 0x25b   :  { %v965_v17 = vadd.f32 %v964_v16, %v963_v15  ;;  %v966_v18 = vpop.f32.mrb[42].mxu1 }
 0x25c   :  { %v967_v19 = vpop.f32.mrb[43].mxu1 }
 0x25d   :  { %v758_v20 = vadd.f32 %v965_v17, %v1320_v63  ;;  %v968_v21 = vadd.f32 %v967_v19, %v966_v18 }
 0x25f   :  { %824 = vst [vmem:[#allocation8 + $0xa0] sm:$0xff] %v758_v20  ;;  %v761_v22 = vadd.f32 %v968_v21, %v1320_v63 }
 0x261   :  { %825 = vst [vmem:[#allocation8 + $0xa8] sm:$0xff] %v761_v22  ;;  %v969_v25 = vpop.f32.mrb[44].mxu1 }
 0x262   :  { %v970_v26 = vpop.f32.mrb[45].mxu1 }
 0x263   :  { %v971_v0 = vadd.f32 %v970_v26, %v969_v25  ;;  %v972_v27 = vpop.f32.mrb[46].mxu1 }
 0x264   :  { %v973_v28 = vpop.f32.mrb[47].mxu1 }
 0x265   :  { %v766_v29 = vadd.f32 %v971_v0, %v1320_v63  ;;  %v974_v30 = vadd.f32 %v973_v28, %v972_v27 }
 0x267   :  { %826 = vst [vmem:[#allocation8 + $0xb0] sm:$0xff] %v766_v29  ;;  %v769_v31 = vadd.f32 %v974_v30, %v1320_v63 }
 0x269   :  { %827 = vst [vmem:[#allocation8 + $0xb8] sm:$0xff] %v769_v31  ;;  %v975_v32 = vpop.f32.mrb[48].mxu1 }
 0x26a   :  { %v976_v33 = vpop.f32.mrb[49].mxu1 }
 0x26b   :  { %v977_v34 = vadd.f32 %v976_v33, %v975_v32  ;;  %v978_v35 = vpop.f32.mrb[50].mxu1 }
 0x26c   :  { %v979_v36 = vpop.f32.mrb[51].mxu1 }
 0x26d   :  { %v774_v37 = vadd.f32 %v977_v34, %v1320_v63  ;;  %v980_v38 = vadd.f32 %v979_v36, %v978_v35 }
 0x26f   :  { %828 = vst [vmem:[#allocation8 + $0xc0] sm:$0xff] %v774_v37  ;;  %v777_v39 = vadd.f32 %v980_v38, %v1320_v63 }
 0x271   :  { %829 = vst [vmem:[#allocation8 + $0xc8] sm:$0xff] %v777_v39  ;;  %v981_v40 = vpop.f32.mrb[52].mxu1 }
 0x272   :  { %v982_v41 = vpop.f32.mrb[53].mxu1 }
 0x273   :  { %v983_v42 = vadd.f32 %v982_v41, %v981_v40  ;;  %v984_v43 = vpop.f32.mrb[54].mxu1 }
 0x274   :  { %v985_v44 = vpop.f32.mrb[55].mxu1 }
 0x275   :  { %v782_v45 = vadd.f32 %v983_v42, %v1320_v63  ;;  %v986_v46 = vadd.f32 %v985_v44, %v984_v43 }
 0x277   :  { %830 = vst [vmem:[#allocation8 + $0xd0] sm:$0xff] %v782_v45  ;;  %v785_v47 = vadd.f32 %v986_v46, %v1320_v63 }
 0x279   :  { %831 = vst [vmem:[#allocation8 + $0xd8] sm:$0xff] %v785_v47  ;;  %v987_v48 = vpop.f32.mrb[56].mxu1 }
 0x27a   :  { %v988_v49 = vpop.f32.mrb[57].mxu1 }
 0x27b   :  { %v989_v50 = vadd.f32 %v988_v49, %v987_v48  ;;  %v990_v51 = vpop.f32.mrb[58].mxu1 }
 0x27c   :  { %v991_v52 = vpop.f32.mrb[59].mxu1 }
 0x27d   :  { %v790_v53 = vadd.f32 %v989_v50, %v1320_v63  ;;  %v992_v54 = vadd.f32 %v991_v52, %v990_v51 }
 0x27f   :  { %832 = vst [vmem:[#allocation8 + $0xe0] sm:$0xff] %v790_v53  ;;  %v793_v55 = vadd.f32 %v992_v54, %v1320_v63 }
 0x281   :  { %833 = vst [vmem:[#allocation8 + $0xe8] sm:$0xff] %v793_v55  ;;  %v993_v56 = vpop.f32.mrb[60].mxu1 }
 0x282   :  { %v994_v57 = vpop.f32.mrb[61].mxu1 }
 0x283   :  { %v995_v58 = vadd.f32 %v994_v57, %v993_v56  ;;  %v996_v59 = vpop.f32.mrb[62].mxu1 }
 0x284   :  { %v997_v60 = vpop.f32.mrb[63].mxu1 }
 0x285   :  { %v798_v61 = vadd.f32 %v995_v58, %v1320_v63  ;;  %v998_v62 = vadd.f32 %v997_v60, %v996_v59 }
 0x287   :  { %834 = vst [vmem:[#allocation8 + $0xf0] sm:$0xff] %v798_v61  ;;  %v801_v1 = vadd.f32 %v998_v62, %v1320_v63 }
 0x289   :  { %835 = vst [vmem:[#allocation8 + $0xf8] sm:$0xff] %v801_v1 }
 0x28a   :  { %1125 = shalt.err (!%p1122_p0)
}
 0x28b   :  { %s1126_s14 = scalar_lea.hbm %s1374_s5, 4096 }
 0x28c   :  { %p1127_p1 = scmp.ne.s32.totalorder %s1374_s5, %s1126_s14  ;;  %p1130_p2 = scmp.lt.u32.totalorder %s1126_s14, %s1374_s5 }
 0x28e   :  { %p1132_p3 = pnand %p1130_p2, %p1127_p1 }
 0x290   :  { %1135 = shalt.err (!%p1132_p3)
}
 0x291   :  { %847 = dma.vmem_to_hbm [thread:$0]  %s842_s10, 4096, %s1374_s5, [#allocation4], %s1144_s30, %s1144_s30, %s1145_s6  }
 0x292   :  { %1140 = dma.done.wait [#allocation4], 4096  }
 0x293   :  { %1141 = vsyncadd [#allocation4], 4294963200 }
 0x294   :  { %851 = vsyncpa [#allocation3], 1 }
 0x295   :  { %852 = vsyncpa [#allocation6], 1 }
 0x296   :  { %853 = vsyncpa [#allocation4], 1 }

</bundles_post_ra>
